<compile_context>
chip_gen: v7x
topology: tpu7x:2x2x1
jax: 0.10.0
libtpu: 0.0.40
codegen_flags: <defaults>
</compile_context>

<pallas_src>
import functools

import jax
import jax.numpy as jnp
from jax.experimental import pallas as pl
from jax.experimental.pallas import tpu as pltpu

F32 = jnp.float32
BF16 = jnp.bfloat16
VMEM = pltpu.MemorySpace.VMEM
SMEM = pltpu.MemorySpace.SMEM


def _ln(x, g, b, eps=1e-5):
    mean = jnp.mean(x, axis=-1, keepdims=True)
    var = jnp.mean(jnp.square(x - mean), axis=-1, keepdims=True)
    return (x - mean) * jax.lax.rsqrt(var + eps) * g + b


# ----------------------------------------------------------------------------
# Full encoder stack: grid over layers, activation resident in VMEM scratch
# ----------------------------------------------------------------------------
def encoder_stack_kernel(emb_ref, bias_ref, eg_ref, eb_ref,
                         wqkv_ref, bqkv_ref, wo_ref, bo_ref,
                         ln1g_ref, ln1b_ref, w1_ref, b1_ref,
                         w2_ref, b2_ref, ln2g_ref, ln2b_ref,
                         pooled_ref, xs_ref,
                         *, batch, seq, hidden, num_heads, head_dim):
    l = pl.program_id(0)

    # Layer 0: fused embedding layernorm (no standalone memory-bound call).
    @pl.when(l == 0)
    def _():
        xs_ref[...] = _ln(emb_ref[...], eg_ref[...], eb_ref[...])

    x = xs_ref[...]                                    # (B*S, H) f32, resident
    x_bf = x.astype(BF16)

    # ---- self-attention -----------------------------------------------------
    # Fused QKV projection: one lane-dense [B*S, H] x [H, 3H] matmul.
    qkv = jnp.dot(x_bf, wqkv_ref[0],
                  preferred_element_type=F32) + bqkv_ref[0]        # (B*S, 3H)
    qkv = qkv.reshape(batch, seq, 3 * hidden)

    bias = bias_ref[...][:, None, :]                   # (B, 1, S) additive mask
    scale = head_dim ** -0.5

    ctx_heads = []
    for h in range(num_heads):                         # static loop: scores only
        q = qkv[:, :, h * head_dim:(h + 1) * head_dim]
        k = qkv[:, :, hidden + h * head_dim:hidden + (h + 1) * head_dim]
        v = qkv[:, :, 2 * hidden + h * head_dim:2 * hidden + (h + 1) * head_dim]
        s = jnp.einsum('bqd,bkd->bqk', q.astype(BF16), k.astype(BF16),
                       preferred_element_type=F32) * scale + bias
        s = s - jnp.max(s, axis=-1, keepdims=True)
        p = jnp.exp(s)
        p = p * pl.reciprocal(jnp.sum(p, axis=-1, keepdims=True), approx=True)
        ctx_heads.append(jnp.einsum('bqk,bkd->bqd', p.astype(BF16),
                                    v.astype(BF16),
                                    preferred_element_type=F32))
    ctx = jnp.concatenate(ctx_heads, axis=-1).reshape(batch * seq, hidden)

    # Fused output projection: one [B*S, H] x [H, H] matmul.
    attn = jnp.dot(ctx.astype(BF16), wo_ref[0],
                   preferred_element_type=F32) + bo_ref[0]

    h1 = _ln(x + attn, ln1g_ref[0], ln1b_ref[0])

    # ---- feed-forward -------------------------------------------------------
    f = jnp.dot(h1.astype(BF16), w1_ref[0],
                preferred_element_type=F32) + b1_ref[0]
    # TODO(synk): RoBERTa uses exact erf-GELU; tanh approximation (EUP) here.
    f = jax.nn.gelu(f, approximate=True)
    f = jnp.dot(f.astype(BF16), w2_ref[0],
                preferred_element_type=F32) + b2_ref[0]

    out = _ln(h1 + f, ln2g_ref[0], ln2b_ref[0])
    xs_ref[...] = out

    # CLS pooling, written once at the last layer (output block is resident).
    @pl.when(l == pl.num_programs(0) - 1)
    def _():
        pooled_ref[...] = out.reshape(batch, seq, hidden)[:, 0, :]


def pallas_encoder_stack(emb2d, bias2d, params, *, batch, seq, hidden,
                         num_heads, num_layers, ffn):
    head_dim = hidden // num_heads
    m = batch * seq
    h3 = 3 * hidden

    def const_spec(shape):
        zeros = (0,) * len(shape)
        return pl.BlockSpec(shape, lambda l, z=zeros: z)

    def layer_spec(per_layer_shape):
        return pl.BlockSpec((1,) + tuple(per_layer_shape),
                            lambda l: (l, 0, 0))

    kernel = functools.partial(encoder_stack_kernel, batch=batch, seq=seq,
                               hidden=hidden, num_heads=num_heads,
                               head_dim=head_dim)
    in_specs = [
        const_spec((m, hidden)),        # embeddings (read at layer 0 only)
        const_spec((batch, seq)),       # attention-mask additive bias
        const_spec((1, hidden)),        # embedding LN gamma
        const_spec((1, hidden)),        # embedding LN beta
        layer_spec((hidden, h3)),       # wqkv
        layer_spec((1, h3)),            # bqkv
        layer_spec((hidden, hidden)),   # wo
        layer_spec((1, hidden)),        # bo
        layer_spec((1, hidden)),        # ln1 gamma
        layer_spec((1, hidden)),        # ln1 beta
        layer_spec((hidden, ffn)),      # w1
        layer_spec((1, ffn)),           # b1
        layer_spec((ffn, hidden)),      # w2
        layer_spec((1, hidden)),        # b2
        layer_spec((1, hidden)),        # ln2 gamma
        layer_spec((1, hidden)),        # ln2 beta
    ]
    return pl.pallas_call(
        kernel,
        out_shape=jax.ShapeDtypeStruct((batch, hidden), F32),
        grid_spec=pltpu.PrefetchScalarGridSpec(
            num_scalar_prefetch=0,
            grid=(num_layers,),
            in_specs=in_specs,
            out_specs=pl.BlockSpec((batch, hidden), lambda l: (0, 0)),
            scratch_shapes=[pltpu.VMEM((m, hidden), F32)],
        ),
        compiler_params=pltpu.CompilerParams(
            dimension_semantics=("arbitrary",),
            vmem_limit_bytes=48 * 1024 * 1024),
        # TODO(synk): at real RoBERTa sizes add a 'parallel' sequence-tile grid
        # axis (flash-style online softmax) so the FFN intermediate fits 64 MiB
        # VMEM on v7x and both TensorCores are used.
    )(emb2d, bias2d, params['emb_ln_g'], params['emb_ln_b'],
      params['wqkv'], params['bqkv'], params['wo'], params['bo'],
      params['ln1g'], params['ln1b'], params['w1'], params['b1'],
      params['w2'], params['b2'], params['ln2g'], params['ln2b'])


# ----------------------------------------------------------------------------
# Fused classifier heads (lane-padded) + summed masked cross-entropy loss
# ----------------------------------------------------------------------------
def heads_loss_kernel(pooled_ref, w_ref, b_ref, la_ref, lg_ref,
                      logits_ref, loss_ref, *, num_age, num_gender):
    pooled = pooled_ref[...]                          # (B, H) f32
    # Both heads in one lane-dense [H, 128] matmul; padded lanes are masked out.
    logits = jnp.dot(pooled, w_ref[...],
                     preferred_element_type=F32) + b_ref[...]      # (B, Cpad)
    logits_ref[...] = logits

    bsz, cpad = logits.shape
    col = jax.lax.broadcasted_iota(jnp.int32, (bsz, cpad), 1)
    neg = jnp.float32(-1e30)

    def masked_ce(valid, onehot):                     # mean-reduction CE
        ml = jnp.where(valid, logits, neg)
        m = jnp.max(ml, axis=-1, keepdims=True)
        lse = jnp.log(jnp.sum(jnp.where(valid, jnp.exp(ml - m), 0.0),
                              axis=-1, keepdims=True)) + m
        return -jnp.sum(jnp.where(onehot, ml - lse, 0.0)) / bsz

    valid_a = col < num_age
    valid_g = (col >= num_age) & (col < num_age + num_gender)
    oh_a = col == la_ref[...]
    oh_g = col == (lg_ref[...] + num_age)
    loss_ref[0] = masked_ce(valid_a, oh_a) + masked_ce(valid_g, oh_g)


def pallas_heads_and_loss(pooled, w_heads, b_heads, labels_age, labels_gender,
                          num_age, num_gender):
    bsz = pooled.shape[0]
    cpad = w_heads.shape[1]
    kernel = functools.partial(heads_loss_kernel, num_age=num_age,
                               num_gender=num_gender)
    return pl.pallas_call(
        kernel,
        out_shape=(jax.ShapeDtypeStruct((bsz, cpad), F32),
                   jax.ShapeDtypeStruct((1,), F32)),
        in_specs=[pl.BlockSpec(memory_space=VMEM)] * 5,
        out_specs=(pl.BlockSpec(memory_space=VMEM),
                   pl.BlockSpec(memory_space=SMEM)),
    )(pooled, w_heads, b_heads,
      labels_age.reshape(-1, 1).astype(jnp.int32),
      labels_gender.reshape(-1, 1).astype(jnp.int32))


# ----------------------------------------------------------------------------
# Deterministic synthetic parameter init (shapes implied by the module)
# ----------------------------------------------------------------------------
def init_params(key, vocab_size, max_pos, hidden, num_heads, ffn, num_layers,
                num_labels_age, num_labels_gender, head_pad=128):
    keys = iter(jax.random.split(key, 16))

    def nrm(shape, scale=0.02, dtype=F32):
        return (scale * jax.random.normal(next(keys), shape)).astype(dtype)

    num_cls = num_labels_age + num_labels_gender
    cpad = max(head_pad, num_cls)
    w_heads = jnp.zeros((hidden, cpad), F32)
    w_heads = w_heads.at[:, :num_labels_age].set(nrm((hidden, num_labels_age)))
    w_heads = w_heads.at[:, num_labels_age:num_cls].set(
        nrm((hidden, num_labels_gender)))

    return {
        'word_emb': nrm((vocab_size, hidden)),
        'pos_emb': nrm((max_pos, hidden)),
        'type_emb': nrm((2, hidden)),
        'emb_ln_g': jnp.ones((1, hidden), F32),
        'emb_ln_b': jnp.zeros((1, hidden), F32),
        # Encoder weights stacked over layers; matmul weights stored in bf16.
        'wqkv': nrm((num_layers, hidden, 3 * hidden), dtype=BF16),
        'bqkv': jnp.zeros((num_layers, 1, 3 * hidden), F32),
        'wo': nrm((num_layers, hidden, hidden), dtype=BF16),
        'bo': jnp.zeros((num_layers, 1, hidden), F32),
        'ln1g': jnp.ones((num_layers, 1, hidden), F32),
        'ln1b': jnp.zeros((num_layers, 1, hidden), F32),
        'w1': nrm((num_layers, hidden, ffn), dtype=BF16),
        'b1': jnp.zeros((num_layers, 1, ffn), F32),
        'w2': nrm((num_layers, ffn, hidden), dtype=BF16),
        'b2': jnp.zeros((num_layers, 1, hidden), F32),
        'ln2g': jnp.ones((num_layers, 1, hidden), F32),
        'ln2b': jnp.zeros((num_layers, 1, hidden), F32),
        # Classifier heads, fused and lane-padded to 128.
        'w_heads': w_heads,
        'b_heads': jnp.zeros((1, cpad), F32),
        'num_labels_age': num_labels_age,
        'num_labels_gender': num_labels_gender,
    }


# ----------------------------------------------------------------------------
# Full forward pass (matches RobertaMultitaskClassifier.forward semantics)
# ----------------------------------------------------------------------------
def roberta_multitask_forward(params, input_ids, attention_mask,
                              labels_age=None, labels_gender=None,
                              num_heads=2):
    b, s = input_ids.shape
    hidden = params['word_emb'].shape[-1]
    num_layers = params['wqkv'].shape[0]
    ffn = params['w1'].shape[-1]
    na = params['num_labels_age']
    ng = params['num_labels_gender']

    # Glue (plain JAX): embedding gather + position/type add; mask bias.
    emb = (jnp.take(params['word_emb'], input_ids, axis=0)
           + params['pos_emb'][None, :s, :]
           + params['type_emb'][0][None, None, :]).astype(F32)
    emb2d = emb.reshape(b * s, hidden)
    bias2d = (1.0 - attention_mask.astype(F32)) * (-1e9)

    pooled = pallas_encoder_stack(emb2d, bias2d, params, batch=b, seq=s,
                                  hidden=hidden, num_heads=num_heads,
                                  num_layers=num_layers, ffn=ffn)
    # TODO(synk): nn.Dropout(0.3) is identity here (inference / eval mode).

    have_labels = labels_age is not None and labels_gender is not None
    la = labels_age if have_labels else jnp.zeros((b,), jnp.int32)
    lg = labels_gender if have_labels else jnp.zeros((b,), jnp.int32)
    logits_pad, loss_arr = pallas_heads_and_loss(
        pooled, params['w_heads'], params['b_heads'], la, lg, na, ng)

    logits_age = logits_pad[:, :na]
    logits_gender = logits_pad[:, na:na + ng]
    loss = loss_arr[0] if have_labels else None
    return {'loss': loss, 'logits_age': logits_age,
            'logits_gender': logits_gender}


if __name__ == "__main__":
    key = jax.random.PRNGKey(0)
    kp, ki = jax.random.split(key)

    B, S, H = 2, 8, 32
    NUM_HEADS, FFN, NUM_LAYERS = 2, 64, 2
    VOCAB, MAX_POS = 100, 64

    params = init_params(kp, VOCAB, MAX_POS, H, NUM_HEADS, FFN, NUM_LAYERS,
                         num_labels_age=3, num_labels_gender=2)

    input_ids = jax.random.randint(ki, (B, S), 0, VOCAB, dtype=jnp.int32)
    attention_mask = jnp.array([[1] * S,
                                [1] * (S - 2) + [0, 0]], dtype=jnp.int32)
    labels_age = jnp.array([0, 2], jnp.int32)
    labels_gender = jnp.array([1, 0], jnp.int32)

    out = roberta_multitask_forward(params, input_ids, attention_mask,
                                    labels_age, labels_gender,
                                    num_heads=NUM_HEADS)
    out = jax.block_until_ready(out)

    assert out['logits_age'].shape == (B, 3)
    assert out['logits_gender'].shape == (B, 2)
    assert bool(jnp.isfinite(out['loss']))
    print("KERNEL_OK")
</pallas_src>

<mosaic_0001>
module attributes {stable_mosaic.version = 11 : i64} {
  func.func @encoder_stack_kernel(%arg0: i32, %arg1: memref<16x32xf32, #tpu.memory_space<vmem>>, %arg2: memref<2x8xf32, #tpu.memory_space<vmem>>, %arg3: memref<1x32xf32, #tpu.memory_space<vmem>>, %arg4: memref<1x32xf32, #tpu.memory_space<vmem>>, %arg5: memref<1x32x96xbf16, #tpu.memory_space<vmem>>, %arg6: memref<1x1x96xf32, #tpu.memory_space<vmem>>, %arg7: memref<1x32x32xbf16, #tpu.memory_space<vmem>>, %arg8: memref<1x1x32xf32, #tpu.memory_space<vmem>>, %arg9: memref<1x1x32xf32, #tpu.memory_space<vmem>>, %arg10: memref<1x1x32xf32, #tpu.memory_space<vmem>>, %arg11: memref<1x32x64xbf16, #tpu.memory_space<vmem>>, %arg12: memref<1x1x64xf32, #tpu.memory_space<vmem>>, %arg13: memref<1x64x32xbf16, #tpu.memory_space<vmem>>, %arg14: memref<1x1x32xf32, #tpu.memory_space<vmem>>, %arg15: memref<1x1x32xf32, #tpu.memory_space<vmem>>, %arg16: memref<1x1x32xf32, #tpu.memory_space<vmem>>, %arg17: memref<2x32xf32, #tpu.memory_space<vmem>>, %arg18: memref<16x32xf32, #tpu.memory_space<vmem>>) attributes {dimension_semantics = [#tpu.dimension_semantics<arbitrary>], iteration_bounds = array<i64: 2>, scalar_prefetch = 0 : i64, scratch_operands = 1 : i64, tpu.core_type = #tpu.core_type<tc>, window_params = [{pipeline_mode = #tpu.pipeline_mode<synchronous>, transform_indices = @transform_0, window_bounds = array<i64: 16, 32>}, {pipeline_mode = #tpu.pipeline_mode<synchronous>, transform_indices = @transform_1, window_bounds = array<i64: 2, 8>}, {pipeline_mode = #tpu.pipeline_mode<synchronous>, transform_indices = @transform_2, window_bounds = array<i64: 1, 32>}, {pipeline_mode = #tpu.pipeline_mode<synchronous>, transform_indices = @transform_3, window_bounds = array<i64: 1, 32>}, {transform_indices = @transform_4, window_bounds = array<i64: 1, 32, 96>}, {transform_indices = @transform_5, window_bounds = array<i64: 1, 1, 96>}, {transform_indices = @transform_6, window_bounds = array<i64: 1, 32, 32>}, {transform_indices = @transform_7, window_bounds = array<i64: 1, 1, 32>}, {transform_indices = @transform_8, window_bounds = array<i64: 1, 1, 32>}, {transform_indices = @transform_9, window_bounds = array<i64: 1, 1, 32>}, {transform_indices = @transform_10, window_bounds = array<i64: 1, 32, 64>}, {transform_indices = @transform_11, window_bounds = array<i64: 1, 1, 64>}, {transform_indices = @transform_12, window_bounds = array<i64: 1, 64, 32>}, {transform_indices = @transform_13, window_bounds = array<i64: 1, 1, 32>}, {transform_indices = @transform_14, window_bounds = array<i64: 1, 1, 32>}, {transform_indices = @transform_15, window_bounds = array<i64: 1, 1, 32>}, {pipeline_mode = #tpu.pipeline_mode<synchronous>, transform_indices = @transform_16, window_bounds = array<i64: 2, 32>}]} {
    %c0_i32 = arith.constant 0 : i32
    %0 = arith.cmpi eq, %arg0, %c0_i32 : i32
    %1 = arith.extui %0 : i1 to i32
    %c0_i32_0 = arith.constant 0 : i32
    %2 = arith.cmpi ne, %1, %c0_i32_0 : i32
    scf.if %2 {
      %c0_70 = arith.constant 0 : index
      %c0_71 = arith.constant 0 : index
      %158 = vector.load %arg1[%c0_70, %c0_71] : memref<16x32xf32, #tpu.memory_space<vmem>>, vector<16x32xf32>
      %c0_72 = arith.constant 0 : index
      %c0_73 = arith.constant 0 : index
      %159 = vector.load %arg3[%c0_72, %c0_73] : memref<1x32xf32, #tpu.memory_space<vmem>>, vector<1x32xf32>
      %c0_74 = arith.constant 0 : index
      %c0_75 = arith.constant 0 : index
      %160 = vector.load %arg4[%c0_74, %c0_75] : memref<1x32xf32, #tpu.memory_space<vmem>>, vector<1x32xf32>
      %cst_76 = arith.constant dense<0.000000e+00> : vector<16xf32>
      %161 = vector.multi_reduction <add>, %158, %cst_76 [1] : vector<16x32xf32> to vector<16xf32>
      %162 = vector.shape_cast %161 : vector<16xf32> to vector<16x1xf32>
      %cst_77 = arith.constant 3.200000e+01 : f32
      %163 = vector.broadcast %cst_77 : f32 to vector<16x1xf32>
      %164 = arith.divf %162, %163 : vector<16x1xf32>
      %165 = vector.broadcast %164 : vector<16x1xf32> to vector<16x32xf32>
      %166 = arith.subf %158, %165 : vector<16x32xf32>
      %167 = arith.mulf %166, %166 : vector<16x32xf32>
      %cst_78 = arith.constant dense<0.000000e+00> : vector<16xf32>
      %168 = vector.multi_reduction <add>, %167, %cst_78 [1] : vector<16x32xf32> to vector<16xf32>
      %169 = vector.shape_cast %168 : vector<16xf32> to vector<16x1xf32>
      %cst_79 = arith.constant 3.200000e+01 : f32
      %170 = vector.broadcast %cst_79 : f32 to vector<16x1xf32>
      %171 = arith.divf %169, %170 : vector<16x1xf32>
      %172 = vector.broadcast %164 : vector<16x1xf32> to vector<16x32xf32>
      %173 = arith.subf %158, %172 : vector<16x32xf32>
      %cst_80 = arith.constant 9.99999974E-6 : f32
      %174 = vector.broadcast %cst_80 : f32 to vector<16x1xf32>
      %175 = arith.addf %171, %174 : vector<16x1xf32>
      %176 = math.rsqrt %175 : vector<16x1xf32>
      %177 = vector.broadcast %176 : vector<16x1xf32> to vector<16x32xf32>
      %178 = arith.mulf %173, %177 : vector<16x32xf32>
      %179 = vector.broadcast %159 : vector<1x32xf32> to vector<16x32xf32>
      %180 = arith.mulf %178, %179 : vector<16x32xf32>
      %181 = vector.broadcast %160 : vector<1x32xf32> to vector<16x32xf32>
      %182 = arith.addf %180, %181 : vector<16x32xf32>
      %c0_81 = arith.constant 0 : index
      %c0_82 = arith.constant 0 : index
      %183 = vector.load %arg18[%c0_81, %c0_82] : memref<16x32xf32, #tpu.memory_space<vmem>>, vector<16x32xf32>
      tpu.vector_store %arg18[%c0_81, %c0_82], %182 {strides = array<i32>} : memref<16x32xf32, #tpu.memory_space<vmem>>, vector<16x32xf32>,
    } else {
    }
    %c0 = arith.constant 0 : index
    %c0_1 = arith.constant 0 : index
    %3 = vector.load %arg18[%c0, %c0_1] : memref<16x32xf32, #tpu.memory_space<vmem>>, vector<16x32xf32>
    %4 = arith.truncf %3 : vector<16x32xf32> to vector<16x32xbf16>
    %c0_2 = arith.constant 0 : index
    %c0_3 = arith.constant 0 : index
    %c0_4 = arith.constant 0 : index
    %5 = vector.load %arg5[%c0_2, %c0_3, %c0_4] : memref<1x32x96xbf16, #tpu.memory_space<vmem>>, vector<1x32x96xbf16>
    %6 = vector.shape_cast %5 : vector<1x32x96xbf16> to vector<32x96xbf16>
    %cst = arith.constant dense<0.000000e+00> : vector<16x96xf32>
    %7 = tpu.matmul %4, %6, %cst {dimension_numbers = #tpu.dot_dimension_numbers<[1], [0], [0], [1], [0, 0, 1, 1], [], []>} : vector<16x32xbf16>, vector<32x96xbf16>, vector<16x96xf32> -> vector<16x96xf32>
    %c0_5 = arith.constant 0 : index
    %c0_6 = arith.constant 0 : index
    %c0_7 = arith.constant 0 : index
    %8 = vector.load %arg6[%c0_5, %c0_6, %c0_7] : memref<1x1x96xf32, #tpu.memory_space<vmem>>, vector<1x1x96xf32>
    %9 = vector.shape_cast %8 : vector<1x1x96xf32> to vector<1x96xf32>
    %10 = vector.broadcast %9 : vector<1x96xf32> to vector<16x96xf32>
    %11 = arith.addf %7, %10 : vector<16x96xf32>
    %12 = vector.shape_cast %11 : vector<16x96xf32> to vector<2x8x96xf32>
    %c0_8 = arith.constant 0 : index
    %c0_9 = arith.constant 0 : index
    %13 = vector.load %arg2[%c0_8, %c0_9] : memref<2x8xf32, #tpu.memory_space<vmem>>, vector<2x8xf32>
    %14 = vector.shape_cast %13 : vector<2x8xf32> to vector<2x1x8xf32>
    %15 = vector.extract_strided_slice %12 {offsets = [0, 0, 0], sizes = [2, 8, 16], strides = [1, 1, 1]} : vector<2x8x96xf32> to vector<2x8x16xf32>
    %16 = vector.extract_strided_slice %12 {offsets = [0, 0, 32], sizes = [2, 8, 16], strides = [1, 1, 1]} : vector<2x8x96xf32> to vector<2x8x16xf32>
    %17 = vector.extract_strided_slice %12 {offsets = [0, 0, 64], sizes = [2, 8, 16], strides = [1, 1, 1]} : vector<2x8x96xf32> to vector<2x8x16xf32>
    %18 = arith.truncf %15 : vector<2x8x16xf32> to vector<2x8x16xbf16>
    %19 = arith.truncf %16 : vector<2x8x16xf32> to vector<2x8x16xbf16>
    "tpu.trace_start"() <{level = 10 : i32, message = "bqd,bkd->bqk"}> : () -> ()
    %cst_10 = arith.constant dense<0.000000e+00> : vector<2x8x8xf32>
    %20 = tpu.matmul %18, %19, %cst_10 {dimension_numbers = #tpu.dot_dimension_numbers<[2], [2], [1], [1], [0, 0, 0, 1, 1, 1], [0], [0]>} : vector<2x8x16xbf16>, vector<2x8x16xbf16>, vector<2x8x8xf32> -> vector<2x8x8xf32>
    "tpu.trace_stop"() : () -> ()
    %cst_11 = arith.constant 2.500000e-01 : f32
    %21 = vector.broadcast %cst_11 : f32 to vector<2x8x8xf32>
    %22 = arith.mulf %20, %21 : vector<2x8x8xf32>
    %23 = vector.broadcast %14 : vector<2x1x8xf32> to vector<2x8x8xf32>
    %24 = arith.addf %22, %23 : vector<2x8x8xf32>
    %cst_12 = arith.constant dense<0xFF800000> : vector<2x8xf32>
    %25 = vector.multi_reduction <maximumf>, %24, %cst_12 [2] : vector<2x8x8xf32> to vector<2x8xf32>
    %26 = vector.shape_cast %25 : vector<2x8xf32> to vector<2x8x1xf32>
    %27 = vector.broadcast %26 : vector<2x8x1xf32> to vector<2x8x8xf32>
    %28 = arith.subf %24, %27 : vector<2x8x8xf32>
    %29 = math.exp %28 : vector<2x8x8xf32>
    %cst_13 = arith.constant dense<0.000000e+00> : vector<2x8xf32>
    %30 = vector.multi_reduction <add>, %29, %cst_13 [2] : vector<2x8x8xf32> to vector<2x8xf32>
    %31 = vector.shape_cast %30 : vector<2x8xf32> to vector<2x8x1xf32>
    %32 = tpu.reciprocal %31 {approx = true} : vector<2x8x1xf32> -> vector<2x8x1xf32>
    %33 = vector.broadcast %32 : vector<2x8x1xf32> to vector<2x8x8xf32>
    %34 = arith.mulf %29, %33 : vector<2x8x8xf32>
    %35 = arith.truncf %34 : vector<2x8x8xf32> to vector<2x8x8xbf16>
    %36 = arith.truncf %17 : vector<2x8x16xf32> to vector<2x8x16xbf16>
    "tpu.trace_start"() <{level = 10 : i32, message = "bqk,bkd->bqd"}> : () -> ()
    %cst_14 = arith.constant dense<0.000000e+00> : vector<2x8x16xf32>
    %37 = tpu.matmul %35, %36, %cst_14 {dimension_numbers = #tpu.dot_dimension_numbers<[2], [1], [1], [2], [0, 0, 0, 1, 1, 2], [0], [0]>} : vector<2x8x8xbf16>, vector<2x8x16xbf16>, vector<2x8x16xf32> -> vector<2x8x16xf32>
    "tpu.trace_stop"() : () -> ()
    %38 = vector.extract_strided_slice %12 {offsets = [0, 0, 16], sizes = [2, 8, 16], strides = [1, 1, 1]} : vector<2x8x96xf32> to vector<2x8x16xf32>
    %39 = vector.extract_strided_slice %12 {offsets = [0, 0, 48], sizes = [2, 8, 16], strides = [1, 1, 1]} : vector<2x8x96xf32> to vector<2x8x16xf32>
    %40 = vector.extract_strided_slice %12 {offsets = [0, 0, 80], sizes = [2, 8, 16], strides = [1, 1, 1]} : vector<2x8x96xf32> to vector<2x8x16xf32>
    %41 = arith.truncf %38 : vector<2x8x16xf32> to vector<2x8x16xbf16>
    %42 = arith.truncf %39 : vector<2x8x16xf32> to vector<2x8x16xbf16>
    "tpu.trace_start"() <{level = 10 : i32, message = "bqd,bkd->bqk"}> : () -> ()
    %cst_15 = arith.constant dense<0.000000e+00> : vector<2x8x8xf32>
    %43 = tpu.matmul %41, %42, %cst_15 {dimension_numbers = #tpu.dot_dimension_numbers<[2], [2], [1], [1], [0, 0, 0, 1, 1, 1], [0], [0]>} : vector<2x8x16xbf16>, vector<2x8x16xbf16>, vector<2x8x8xf32> -> vector<2x8x8xf32>
    "tpu.trace_stop"() : () -> ()
    %cst_16 = arith.constant 2.500000e-01 : f32
    %44 = vector.broadcast %cst_16 : f32 to vector<2x8x8xf32>
    %45 = arith.mulf %43, %44 : vector<2x8x8xf32>
    %46 = vector.broadcast %14 : vector<2x1x8xf32> to vector<2x8x8xf32>
    %47 = arith.addf %45, %46 : vector<2x8x8xf32>
    %cst_17 = arith.constant dense<0xFF800000> : vector<2x8xf32>
    %48 = vector.multi_reduction <maximumf>, %47, %cst_17 [2] : vector<2x8x8xf32> to vector<2x8xf32>
    %49 = vector.shape_cast %48 : vector<2x8xf32> to vector<2x8x1xf32>
    %50 = vector.broadcast %49 : vector<2x8x1xf32> to vector<2x8x8xf32>
    %51 = arith.subf %47, %50 : vector<2x8x8xf32>
    %52 = math.exp %51 : vector<2x8x8xf32>
    %cst_18 = arith.constant dense<0.000000e+00> : vector<2x8xf32>
    %53 = vector.multi_reduction <add>, %52, %cst_18 [2] : vector<2x8x8xf32> to vector<2x8xf32>
    %54 = vector.shape_cast %53 : vector<2x8xf32> to vector<2x8x1xf32>
    %55 = tpu.reciprocal %54 {approx = true} : vector<2x8x1xf32> -> vector<2x8x1xf32>
    %56 = vector.broadcast %55 : vector<2x8x1xf32> to vector<2x8x8xf32>
    %57 = arith.mulf %52, %56 : vector<2x8x8xf32>
    %58 = arith.truncf %57 : vector<2x8x8xf32> to vector<2x8x8xbf16>
    %59 = arith.truncf %40 : vector<2x8x16xf32> to vector<2x8x16xbf16>
    "tpu.trace_start"() <{level = 10 : i32, message = "bqk,bkd->bqd"}> : () -> ()
    %cst_19 = arith.constant dense<0.000000e+00> : vector<2x8x16xf32>
    %60 = tpu.matmul %58, %59, %cst_19 {dimension_numbers = #tpu.dot_dimension_numbers<[2], [1], [1], [2], [0, 0, 0, 1, 1, 2], [0], [0]>} : vector<2x8x8xbf16>, vector<2x8x16xbf16>, vector<2x8x16xf32> -> vector<2x8x16xf32>
    "tpu.trace_stop"() : () -> ()
    %61 = tpu.concatenate %37, %60 in 2 : vector<2x8x16xf32>, vector<2x8x16xf32> -> vector<2x8x32xf32>
    %62 = vector.shape_cast %61 : vector<2x8x32xf32> to vector<16x32xf32>
    %63 = arith.truncf %62 : vector<16x32xf32> to vector<16x32xbf16>
    %c0_20 = arith.constant 0 : index
    %c0_21 = arith.constant 0 : index
    %c0_22 = arith.constant 0 : index
    %64 = vector.load %arg7[%c0_20, %c0_21, %c0_22] : memref<1x32x32xbf16, #tpu.memory_space<vmem>>, vector<1x32x32xbf16>
    %65 = vector.shape_cast %64 : vector<1x32x32xbf16> to vector<32x32xbf16>
    %cst_23 = arith.constant dense<0.000000e+00> : vector<16x32xf32>
    %66 = tpu.matmul %63, %65, %cst_23 {dimension_numbers = #tpu.dot_dimension_numbers<[1], [0], [0], [1], [0, 0, 1, 1], [], []>} : vector<16x32xbf16>, vector<32x32xbf16>, vector<16x32xf32> -> vector<16x32xf32>
    %c0_24 = arith.constant 0 : index
    %c0_25 = arith.constant 0 : index
    %c0_26 = arith.constant 0 : index
    %67 = vector.load %arg8[%c0_24, %c0_25, %c0_26] : memref<1x1x32xf32, #tpu.memory_space<vmem>>, vector<1x1x32xf32>
    %68 = vector.shape_cast %67 : vector<1x1x32xf32> to vector<1x32xf32>
    %69 = vector.broadcast %68 : vector<1x32xf32> to vector<16x32xf32>
    %70 = arith.addf %66, %69 : vector<16x32xf32>
    %71 = arith.addf %3, %70 : vector<16x32xf32>
    %c0_27 = arith.constant 0 : index
    %c0_28 = arith.constant 0 : index
    %c0_29 = arith.constant 0 : index
    %72 = vector.load %arg9[%c0_27, %c0_28, %c0_29] : memref<1x1x32xf32, #tpu.memory_space<vmem>>, vector<1x1x32xf32>
    %73 = vector.shape_cast %72 : vector<1x1x32xf32> to vector<1x32xf32>
    %c0_30 = arith.constant 0 : index
    %c0_31 = arith.constant 0 : index
    %c0_32 = arith.constant 0 : index
    %74 = vector.load %arg10[%c0_30, %c0_31, %c0_32] : memref<1x1x32xf32, #tpu.memory_space<vmem>>, vector<1x1x32xf32>
    %75 = vector.shape_cast %74 : vector<1x1x32xf32> to vector<1x32xf32>
    %cst_33 = arith.constant dense<0.000000e+00> : vector<16xf32>
    %76 = vector.multi_reduction <add>, %71, %cst_33 [1] : vector<16x32xf32> to vector<16xf32>
    %77 = vector.shape_cast %76 : vector<16xf32> to vector<16x1xf32>
    %cst_34 = arith.constant 3.200000e+01 : f32
    %78 = vector.broadcast %cst_34 : f32 to vector<16x1xf32>
    %79 = arith.divf %77, %78 : vector<16x1xf32>
    %80 = vector.broadcast %79 : vector<16x1xf32> to vector<16x32xf32>
    %81 = arith.subf %71, %80 : vector<16x32xf32>
    %82 = arith.mulf %81, %81 : vector<16x32xf32>
    %cst_35 = arith.constant dense<0.000000e+00> : vector<16xf32>
    %83 = vector.multi_reduction <add>, %82, %cst_35 [1] : vector<16x32xf32> to vector<16xf32>
    %84 = vector.shape_cast %83 : vector<16xf32> to vector<16x1xf32>
    %cst_36 = arith.constant 3.200000e+01 : f32
    %85 = vector.broadcast %cst_36 : f32 to vector<16x1xf32>
    %86 = arith.divf %84, %85 : vector<16x1xf32>
    %87 = vector.broadcast %79 : vector<16x1xf32> to vector<16x32xf32>
    %88 = arith.subf %71, %87 : vector<16x32xf32>
    %cst_37 = arith.constant 9.99999974E-6 : f32
    %89 = vector.broadcast %cst_37 : f32 to vector<16x1xf32>
    %90 = arith.addf %86, %89 : vector<16x1xf32>
    %91 = math.rsqrt %90 : vector<16x1xf32>
    %92 = vector.broadcast %91 : vector<16x1xf32> to vector<16x32xf32>
    %93 = arith.mulf %88, %92 : vector<16x32xf32>
    %94 = vector.broadcast %73 : vector<1x32xf32> to vector<16x32xf32>
    %95 = arith.mulf %93, %94 : vector<16x32xf32>
    %96 = vector.broadcast %75 : vector<1x32xf32> to vector<16x32xf32>
    %97 = arith.addf %95, %96 : vector<16x32xf32>
    %98 = arith.truncf %97 : vector<16x32xf32> to vector<16x32xbf16>
    %c0_38 = arith.constant 0 : index
    %c0_39 = arith.constant 0 : index
    %c0_40 = arith.constant 0 : index
    %99 = vector.load %arg11[%c0_38, %c0_39, %c0_40] : memref<1x32x64xbf16, #tpu.memory_space<vmem>>, vector<1x32x64xbf16>
    %100 = vector.shape_cast %99 : vector<1x32x64xbf16> to vector<32x64xbf16>
    %cst_41 = arith.constant dense<0.000000e+00> : vector<16x64xf32>
    %101 = tpu.matmul %98, %100, %cst_41 {dimension_numbers = #tpu.dot_dimension_numbers<[1], [0], [0], [1], [0, 0, 1, 1], [], []>} : vector<16x32xbf16>, vector<32x64xbf16>, vector<16x64xf32> -> vector<16x64xf32>
    %c0_42 = arith.constant 0 : index
    %c0_43 = arith.constant 0 : index
    %c0_44 = arith.constant 0 : index
    %102 = vector.load %arg12[%c0_42, %c0_43, %c0_44] : memref<1x1x64xf32, #tpu.memory_space<vmem>>, vector<1x1x64xf32>
    %103 = vector.shape_cast %102 : vector<1x1x64xf32> to vector<1x64xf32>
    %104 = vector.broadcast %103 : vector<1x64xf32> to vector<16x64xf32>
    %105 = arith.addf %101, %104 : vector<16x64xf32>
    %106 = arith.mulf %105, %105 : vector<16x64xf32>
    %107 = arith.mulf %105, %106 : vector<16x64xf32>
    %cst_45 = arith.constant 4.471500e-02 : f32
    %108 = vector.broadcast %cst_45 : f32 to vector<16x64xf32>
    %109 = arith.mulf %108, %107 : vector<16x64xf32>
    %110 = arith.addf %105, %109 : vector<16x64xf32>
    %cst_46 = arith.constant 0.797884583 : f32
    %111 = vector.broadcast %cst_46 : f32 to vector<16x64xf32>
    %112 = arith.mulf %111, %110 : vector<16x64xf32>
    %113 = math.tanh %112 : vector<16x64xf32>
    %cst_47 = arith.constant 1.000000e+00 : f32
    %114 = vector.broadcast %cst_47 : f32 to vector<16x64xf32>
    %115 = arith.addf %114, %113 : vector<16x64xf32>
    %cst_48 = arith.constant 5.000000e-01 : f32
    %116 = vector.broadcast %cst_48 : f32 to vector<16x64xf32>
    %117 = arith.mulf %116, %115 : vector<16x64xf32>
    %118 = arith.mulf %105, %117 : vector<16x64xf32>
    %119 = arith.truncf %118 : vector<16x64xf32> to vector<16x64xbf16>
    %c0_49 = arith.constant 0 : index
    %c0_50 = arith.constant 0 : index
    %c0_51 = arith.constant 0 : index
    %120 = vector.load %arg13[%c0_49, %c0_50, %c0_51] : memref<1x64x32xbf16, #tpu.memory_space<vmem>>, vector<1x64x32xbf16>
    %121 = vector.shape_cast %120 : vector<1x64x32xbf16> to vector<64x32xbf16>
    %cst_52 = arith.constant dense<0.000000e+00> : vector<16x32xf32>
    %122 = tpu.matmul %119, %121, %cst_52 {dimension_numbers = #tpu.dot_dimension_numbers<[1], [0], [0], [1], [0, 0, 1, 1], [], []>} : vector<16x64xbf16>, vector<64x32xbf16>, vector<16x32xf32> -> vector<16x32xf32>
    %c0_53 = arith.constant 0 : index
    %c0_54 = arith.constant 0 : index
    %c0_55 = arith.constant 0 : index
    %123 = vector.load %arg14[%c0_53, %c0_54, %c0_55] : memref<1x1x32xf32, #tpu.memory_space<vmem>>, vector<1x1x32xf32>
    %124 = vector.shape_cast %123 : vector<1x1x32xf32> to vector<1x32xf32>
    %125 = vector.broadcast %124 : vector<1x32xf32> to vector<16x32xf32>
    %126 = arith.addf %122, %125 : vector<16x32xf32>
    %127 = arith.addf %97, %126 : vector<16x32xf32>
    %c0_56 = arith.constant 0 : index
    %c0_57 = arith.constant 0 : index
    %c0_58 = arith.constant 0 : index
    %128 = vector.load %arg15[%c0_56, %c0_57, %c0_58] : memref<1x1x32xf32, #tpu.memory_space<vmem>>, vector<1x1x32xf32>
    %129 = vector.shape_cast %128 : vector<1x1x32xf32> to vector<1x32xf32>
    %c0_59 = arith.constant 0 : index
    %c0_60 = arith.constant 0 : index
    %c0_61 = arith.constant 0 : index
    %130 = vector.load %arg16[%c0_59, %c0_60, %c0_61] : memref<1x1x32xf32, #tpu.memory_space<vmem>>, vector<1x1x32xf32>
    %131 = vector.shape_cast %130 : vector<1x1x32xf32> to vector<1x32xf32>
    %cst_62 = arith.constant dense<0.000000e+00> : vector<16xf32>
    %132 = vector.multi_reduction <add>, %127, %cst_62 [1] : vector<16x32xf32> to vector<16xf32>
    %133 = vector.shape_cast %132 : vector<16xf32> to vector<16x1xf32>
    %cst_63 = arith.constant 3.200000e+01 : f32
    %134 = vector.broadcast %cst_63 : f32 to vector<16x1xf32>
    %135 = arith.divf %133, %134 : vector<16x1xf32>
    %136 = vector.broadcast %135 : vector<16x1xf32> to vector<16x32xf32>
    %137 = arith.subf %127, %136 : vector<16x32xf32>
    %138 = arith.mulf %137, %137 : vector<16x32xf32>
    %cst_64 = arith.constant dense<0.000000e+00> : vector<16xf32>
    %139 = vector.multi_reduction <add>, %138, %cst_64 [1] : vector<16x32xf32> to vector<16xf32>
    %140 = vector.shape_cast %139 : vector<16xf32> to vector<16x1xf32>
    %cst_65 = arith.constant 3.200000e+01 : f32
    %141 = vector.broadcast %cst_65 : f32 to vector<16x1xf32>
    %142 = arith.divf %140, %141 : vector<16x1xf32>
    %143 = vector.broadcast %135 : vector<16x1xf32> to vector<16x32xf32>
    %144 = arith.subf %127, %143 : vector<16x32xf32>
    %cst_66 = arith.constant 9.99999974E-6 : f32
    %145 = vector.broadcast %cst_66 : f32 to vector<16x1xf32>
    %146 = arith.addf %142, %145 : vector<16x1xf32>
    %147 = math.rsqrt %146 : vector<16x1xf32>
    %148 = vector.broadcast %147 : vector<16x1xf32> to vector<16x32xf32>
    %149 = arith.mulf %144, %148 : vector<16x32xf32>
    %150 = vector.broadcast %129 : vector<1x32xf32> to vector<16x32xf32>
    %151 = arith.mulf %149, %150 : vector<16x32xf32>
    %152 = vector.broadcast %131 : vector<1x32xf32> to vector<16x32xf32>
    %153 = arith.addf %151, %152 : vector<16x32xf32>
    %c0_67 = arith.constant 0 : index
    %c0_68 = arith.constant 0 : index
    %154 = vector.load %arg18[%c0_67, %c0_68] : memref<16x32xf32, #tpu.memory_space<vmem>>, vector<16x32xf32>
    tpu.vector_store %arg18[%c0_67, %c0_68], %153 {strides = array<i32>} : memref<16x32xf32, #tpu.memory_space<vmem>>, vector<16x32xf32>,
    %c1_i32 = arith.constant 1 : i32
    %155 = arith.cmpi eq, %arg0, %c1_i32 : i32
    %156 = arith.extui %155 : i1 to i32
    %c0_i32_69 = arith.constant 0 : i32
    %157 = arith.cmpi ne, %156, %c0_i32_69 : i32
    scf.if %157 {
      %158 = vector.shape_cast %153 : vector<16x32xf32> to vector<2x8x32xf32>
      %159 = vector.extract_strided_slice %158 {offsets = [0, 0, 0], sizes = [2, 1, 32], strides = [1, 1, 1]} : vector<2x8x32xf32> to vector<2x1x32xf32>
      %160 = vector.shape_cast %159 : vector<2x1x32xf32> to vector<2x32xf32>
      %c0_70 = arith.constant 0 : index
      %c0_71 = arith.constant 0 : index
      %161 = vector.load %arg17[%c0_70, %c0_71] : memref<2x32xf32, #tpu.memory_space<vmem>>, vector<2x32xf32>
      tpu.vector_store %arg17[%c0_70, %c0_71], %160 {strides = array<i32>} : memref<2x32xf32, #tpu.memory_space<vmem>>, vector<2x32xf32>,
    } else {
    }
    return
  }
  func.func @transform_0(%arg0: i32) -> (i32, i32) {
    %c0_i32 = arith.constant 0 : i32
    %c0_i32_0 = arith.constant 0 : i32
    %c0_i32_1 = arith.constant 0 : i32
    return %c0_i32, %c0_i32_0 : i32, i32
  }
  func.func @transform_1(%arg0: i32) -> (i32, i32) {
    %c0_i32 = arith.constant 0 : i32
    %c0_i32_0 = arith.constant 0 : i32
    %c0_i32_1 = arith.constant 0 : i32
    return %c0_i32, %c0_i32_0 : i32, i32
  }
  func.func @transform_2(%arg0: i32) -> (i32, i32) {
    %c0_i32 = arith.constant 0 : i32
    %c0_i32_0 = arith.constant 0 : i32
    %c0_i32_1 = arith.constant 0 : i32
    return %c0_i32, %c0_i32_0 : i32, i32
  }
  func.func @transform_3(%arg0: i32) -> (i32, i32) {
    %c0_i32 = arith.constant 0 : i32
    %c0_i32_0 = arith.constant 0 : i32
    %c0_i32_1 = arith.constant 0 : i32
    return %c0_i32, %c0_i32_0 : i32, i32
  }
  func.func @transform_4(%arg0: i32) -> (i32, i32, i32) {
    %c0_i32 = arith.constant 0 : i32
    %c0_i32_0 = arith.constant 0 : i32
    %c0_i32_1 = arith.constant 0 : i32
    return %arg0, %c0_i32, %c0_i32_0 : i32, i32, i32
  }
  func.func @transform_5(%arg0: i32) -> (i32, i32, i32) {
    %c0_i32 = arith.constant 0 : i32
    %c0_i32_0 = arith.constant 0 : i32
    %c0_i32_1 = arith.constant 0 : i32
    return %arg0, %c0_i32, %c0_i32_0 : i32, i32, i32
  }
  func.func @transform_6(%arg0: i32) -> (i32, i32, i32) {
    %c0_i32 = arith.constant 0 : i32
    %c0_i32_0 = arith.constant 0 : i32
    %c0_i32_1 = arith.constant 0 : i32
    return %arg0, %c0_i32, %c0_i32_0 : i32, i32, i32
  }
  func.func @transform_7(%arg0: i32) -> (i32, i32, i32) {
    %c0_i32 = arith.constant 0 : i32
    %c0_i32_0 = arith.constant 0 : i32
    %c0_i32_1 = arith.constant 0 : i32
    return %arg0, %c0_i32, %c0_i32_0 : i32, i32, i32
  }
  func.func @transform_8(%arg0: i32) -> (i32, i32, i32) {
    %c0_i32 = arith.constant 0 : i32
    %c0_i32_0 = arith.constant 0 : i32
    %c0_i32_1 = arith.constant 0 : i32
    return %arg0, %c0_i32, %c0_i32_0 : i32, i32, i32
  }
  func.func @transform_9(%arg0: i32) -> (i32, i32, i32) {
    %c0_i32 = arith.constant 0 : i32
    %c0_i32_0 = arith.constant 0 : i32
    %c0_i32_1 = arith.constant 0 : i32
    return %arg0, %c0_i32, %c0_i32_0 : i32, i32, i32
  }
  func.func @transform_10(%arg0: i32) -> (i32, i32, i32) {
    %c0_i32 = arith.constant 0 : i32
    %c0_i32_0 = arith.constant 0 : i32
    %c0_i32_1 = arith.constant 0 : i32
    return %arg0, %c0_i32, %c0_i32_0 : i32, i32, i32
  }
  func.func @transform_11(%arg0: i32) -> (i32, i32, i32) {
    %c0_i32 = arith.constant 0 : i32
    %c0_i32_0 = arith.constant 0 : i32
    %c0_i32_1 = arith.constant 0 : i32
    return %arg0, %c0_i32, %c0_i32_0 : i32, i32, i32
  }
  func.func @transform_12(%arg0: i32) -> (i32, i32, i32) {
    %c0_i32 = arith.constant 0 : i32
    %c0_i32_0 = arith.constant 0 : i32
    %c0_i32_1 = arith.constant 0 : i32
    return %arg0, %c0_i32, %c0_i32_0 : i32, i32, i32
  }
  func.func @transform_13(%arg0: i32) -> (i32, i32, i32) {
    %c0_i32 = arith.constant 0 : i32
    %c0_i32_0 = arith.constant 0 : i32
    %c0_i32_1 = arith.constant 0 : i32
    return %arg0, %c0_i32, %c0_i32_0 : i32, i32, i32
  }
  func.func @transform_14(%arg0: i32) -> (i32, i32, i32) {
    %c0_i32 = arith.constant 0 : i32
    %c0_i32_0 = arith.constant 0 : i32
    %c0_i32_1 = arith.constant 0 : i32
    return %arg0, %c0_i32, %c0_i32_0 : i32, i32, i32
  }
  func.func @transform_15(%arg0: i32) -> (i32, i32, i32) {
    %c0_i32 = arith.constant 0 : i32
    %c0_i32_0 = arith.constant 0 : i32
    %c0_i32_1 = arith.constant 0 : i32
    return %arg0, %c0_i32, %c0_i32_0 : i32, i32, i32
  }
  func.func @transform_16(%arg0: i32) -> (i32, i32) {
    %c0_i32 = arith.constant 0 : i32
    %c0_i32_0 = arith.constant 0 : i32
    %c0_i32_1 = arith.constant 0 : i32
    return %c0_i32, %c0_i32_0 : i32, i32
  }
}

</mosaic_0001>

<bundles_post_ra>
// kernel: tpu_custom_call.1
= control target key start
LH: loop header
LB: loop body
LE: loop exit
PB: predicated region body
PF: predicated region fallthrough
CT: control target
= control target key end

     0   :  { %s2671_s0 = inlined_call_operand.hbm [shape: f32[16,32], index: 0, kind: input, shape index: {}]   ;;  %s2672_s1 = inlined_call_operand.vmem [shape: f32[2,8], index: 1, kind: input, shape index: {}]   ;;  %s2673_s2 = inlined_call_operand.vmem [shape: f32[1,32], index: 2, kind: input, shape index: {}]   ;;  %s2674_s3 = inlined_call_operand.hbm [shape: f32[1,32], index: 3, kind: input, shape index: {}]   ;;  %s2675_s4 = inlined_call_operand.vmem [shape: bf16[2,32,96], index: 4, kind: input, shape index: {}]   ;;  %s2676_s5 = inlined_call_operand.vmem [shape: f32[2,1,96], index: 5, kind: input, shape index: {}]   ;;  %s2677_s6 = inlined_call_operand.vmem [shape: bf16[2,32,32], index: 6, kind: input, shape index: {}]   ;;  %s2678_s7 = inlined_call_operand.vmem [shape: f32[2,1,32], index: 7, kind: input, shape index: {}]   ;;  %s2679_s8 = inlined_call_operand.vmem [shape: f32[2,1,32], index: 8, kind: input, shape index: {}]   ;;  %s2680_s9 = inlined_call_operand.vmem [shape: f32[2,1,32], index: 9, kind: input, shape index: {}]   ;;  %s2681_s10 = inlined_call_operand.vmem [shape: bf16[2,32,64], index: 10, kind: input, shape index: {}]   ;;  %s2682_s11 = inlined_call_operand.vmem [shape: f32[2,1,64], index: 11, kind: input, shape index: {}]   ;;  %s2683_s12 = inlined_call_operand.vmem [shape: bf16[2,64,32], index: 12, kind: input, shape index: {}]   ;;  %s2684_s13 = inlined_call_operand.vmem [shape: f32[2,1,32], index: 13, kind: input, shape index: {}]   ;;  %s2685_s14 = inlined_call_operand.vmem [shape: f32[2,1,32], index: 14, kind: input, shape index: {}]   ;;  %s2686_s15 = inlined_call_operand.vmem [shape: f32[2,1,32], index: 15, kind: input, shape index: {}]   ;;  %s2687_s16 = inlined_call_operand.hbm [shape: f32[2,32], index: 16, kind: output, shape index: {}]  }
   0x1   :  { %2695 = sst [smem:[#allocation14_spill]] %s2671_s0 }
   0x2   :  { %2696 = sst [smem:[#allocation15_spill]] %s2672_s1 }
   0x3   :  { %2697 = sst [smem:[#allocation16_spill]] %s2674_s3 }
   0x4   :  { %2698 = sst [smem:[#allocation17_spill]] %s2675_s4 }
   0x5   :  { %2699 = sst [smem:[#allocation18_spill]] %s2677_s6 }
   0x6   :  { %2700 = sst [smem:[#allocation19_spill]] %s2687_s16 }
   0x7   :  { %21 = vsyncpa [#allocation4], 0 }
   0x8   :  { %22 = vsyncpa [#allocation7], 0 }
   0x9   :  { %23 = vsyncpa [#allocation5], 0  ;;  %s2319_s21 = smov 0  }
   0xa LB: > { %2701 = sst [smem:[#allocation12_spill]] %s2218_s21  ;;  %s2325_s22 = sadd.s32 4294967295, %s2218_s21   ;;  %s2218_s21 = sphi %s2319_s21, %s29_s21  }
   0xb   : > { %p1852_p0 = scmp.ge.s32.totalorder %s2218_s21, 1  ;;  %p451_p1 = scmp.lt.s32.totalorder %s2218_s21, 3 }
   0xc   : > { %s2220_s23 = smov [#allocation3]   ;;  %p2689_p4 = scmp.eq.s32.totalorder %s2325_s22, 0 }
   0xd   : > { %s463_s24 = sshll.u32 %s2220_s23, 4  ;;  %p2330_p3 = pnand %p1852_p0, %p451_p1  ;;  %s464_s24 = int_to_ptr.vmem [resolvable:$true] %s463_s24 }
   0xe   : > { %s2221_s26 = smov [#allocation6]   ;;  %s2704_s0 = sld [smem:[#allocation14_spill]] }
   0xf   : > { %s2702_s25 = scalar_select %p2330_p3, 1, 0 }
  0x10   : > { %p2036_p5 = pneg %p2330_p3  ;;  %s483_s27 = sshll.u32 %s2221_s26, 4  ;;  %s2343_s27 = int_to_ptr.vmem [resolvable:$true] %s483_s27 }
  0x12   : > { %p2339_p6 = pnand %p2689_p4, %p2036_p5 }
  0x14   : > { %s2118_s17 = scalar_lea.hbm %s2704_s0, 256  ;;  %p2120_p8 = pneg %p2339_p6 }
  0x15   : > { %p2119_p7 = scmp.ne.s32.totalorder %s2704_s0, %s2118_s17  ;;  %p2125_p11 = scmp.lt.u32.totalorder %s2118_s17, %s2704_s0 }
  0x17   : > { %p2121_p9 = pnand %p2120_p8, %p2119_p7 }
  0x19   : > { %p2122_p10 = pneg %p2121_p9 }
  0x1b   : > { %p2127_p12 = pnand %p2125_p11, %p2122_p10 }
  0x1d   : > { %2130 = shalt.err (!%p2127_p12)
}
  0x1e   : > { %s2131_s26 = scalar_lea.vmem %s464_s24, 256  ;;  %p2139_p5 = scmp.lt.s32.totalorder %s464_s24, %s464_s24 }
  0x1f   : > { %p2132_p13 = scmp.ne.s32.totalorder %s464_s24, %s2131_s26  ;;  %p2140_p2 = scmp.lt.s32.totalorder %s2131_s26, %s2131_s26 }
  0x21   : > { %p2134_p0 = pnand %p2132_p13, %p2120_p8  ;;  %p2141_p4 = por %p2140_p2, %p2139_p5 }
  0x23   : > { %p2135_p1 = pneg %p2134_p0 }
  0x25   : > { %p2142_p3 = pnand %p2141_p4, %p2135_p1 }
  0x27   : > { %2145 = shalt.err (!%p2142_p3)
}
  0x28   : > { %s2222_s29 = smov 128   ;;  %s2223_s30 = smov 8  }
  0x29   : > { %2039 = dma.hbm_to_vmem [thread:$0]  (!%p2339_p6), %s2704_s0, 256, %s464_s24, [#allocation4], %s2222_s29, %s2222_s29, %s2223_s30  }
  0x2a   : > { %s2705_s3 = sld [smem:[#allocation16_spill]] }
  0x30   : > { %s2146_s23 = scalar_lea.hbm %s2705_s3, 16 }
  0x31   : > { %p2147_p7 = scmp.ne.s32.totalorder %s2705_s3, %s2146_s23  ;;  %p2153_p4 = scmp.lt.u32.totalorder %s2146_s23, %s2705_s3 }
  0x33   : > { %p2149_p2 = pnand %p2147_p7, %p2120_p8 }
  0x35   : > { %p2150_p3 = pneg %p2149_p2 }
  0x37   : > { %p2155_p9 = pnand %p2153_p4, %p2150_p3 }
  0x39   : > { %2158 = shalt.err (!%p2155_p9)
}
  0x3a   : > { %s2159_s24 = scalar_lea.vmem %s2343_s27, 16  ;;  %s2166_s16 = scalar_lea.vmem %s2343_s27, 32 }
  0x3b   : > { %p2160_p10 = scmp.ne.s32.totalorder %s2343_s27, %s2159_s24  ;;  %p2167_p13 = scmp.lt.s32.totalorder %s2343_s27, %s2343_s27 }
  0x3c   : > { %p2168_p0 = scmp.lt.s32.totalorder %s2166_s16, %s2159_s24 }
  0x3d   : > { %p2162_p11 = pnand %p2160_p10, %p2120_p8 }
  0x3e   : > { %p2169_p1 = por %p2168_p0, %p2167_p13 }
  0x3f   : > { %p2163_p12 = pneg %p2162_p11 }
  0x41   : > { %p2170_p5 = pnand %p2169_p1, %p2163_p12 }
  0x43   : > { %2173 = shalt.err (!%p2170_p5)
}
  0x44   : > { %2042 = dma.hbm_to_vmem [thread:$0]  (!%p2339_p6), %s2705_s3, 16, %s2343_s27, [#allocation7]  }
  0x45   : > { %p2706_p7 = scmp.ne.s32.totalorder %s2702_s25, 0 }
  0x47   : > { %576 = sbr.rel (%p2706_p7) target bundleno = 3509 (0xdb5), region = 84 }
  0x4e   : > { %p2707_p8 = scmp.eq.s32.totalorder %s2325_s22, 0 }
  0x50   : > { %2205 = dma.done.wait (%p2707_p8), [#allocation4], 256   ;;  %p2708_p2 = pmov %p2707_p8 }
  0x52   : > { %2207 = vsyncadd (%p2708_p2), [#allocation4], 4294967040  ;;  %p2709_p3 = pmov %p2708_p2 }
  0x53   : > { %p2710_p4 = pmov %p2708_p2 }
  0x54   : > { %2209 = dma.done.wait (%p2709_p3), [#allocation7], 16  }
  0x55   : > { %2211 = vsyncadd (%p2710_p4), [#allocation7], 4294967280  ;;  %p664_p9 = scmp.lt.s32.totalorder %s2325_s22, 1  ;;  %s2711_s4 = sld [smem:[#allocation17_spill]] }
  0x56   : > { %s2712_s6 = sld [smem:[#allocation18_spill]]  ;;  %p2714_p6 = scmp.ne.s32.totalorder %s2325_s22, 0 }
  0x57   : > { %s2405_s28 = scalar_select %p664_p9, %s2325_s22, 1 }
  0x58   : > { %712 = sbr.rel (%p2714_p6) target bundleno = 407 (0x197), region = 96  ;;  %v713_v0 = vld [vmem:[#allocation3] sm:$0xff] (!%p2714_p6)  ;;  %vm717_vm0 = vcmask (!%p2714_p6), 261120   ;;  %v714_v1 = vld [vmem:[#allocation3 + $0x8] sm:$0xff] (!%p2714_p6)  ;;  %v1868_v21 = vld [vmem:[%s2673_s2] ss:$0 sm:$0xff] (!%p2714_p6) }
  0x59   : > { %s1906_s25 = sshll.u32 %s2405_s28, 4  ;;  %s701_s27 = scalar_lea.vmem %s2684_s13, %s2405_s28  ;;  %v718_v2 = vsel (!%p2714_p6), %vm717_vm0, %v713_v0, 0.0  ;;  %v721_v3 = vsel (!%p2714_p6), %vm717_vm0, %v714_v1, 0.0  ;;  %v1869_v23 = vld [vmem:[#allocation6] ss:$0 sm:$0xff] (!%p2714_p6) }
  0x5a   : > { %s704_s17 = scalar_lea.vmem %s2685_s14, %s2405_s28  ;;  %s707_s3 = scalar_lea.vmem %s2686_s15, %s2405_s28  ;;  %719 = vadd.xlane.f32.xlu0 (!%p2714_p6), %v718_v2 }
  0x5b   : > { %s2415_s19 = scalar_lea.vmem %s2711_s4, %s1906_s25  ;;  %s2437_s4 = scalar_lea.vmem %s2681_s10, %s1906_s25 }
  0x5c   : > { %s2420_s26 = scalar_lea.vmem %s2712_s6, %s1906_s25  ;;  %s693_s6 = scalar_lea.vmem %s2682_s11, %s2405_s28 }
  0x5d   : > { %2713 = sst [smem:[#allocation13_spill]] %s2420_s26  ;;  %s1909_s26 = sshll.u32 %s2405_s28, 5 }
  0x5e   : > { %s2447_s1 = scalar_lea.vmem %s2683_s12, %s1909_s26  ;;  %722 = vadd.xlane.f32.xlu0 (!%p2714_p6), %v721_v3 }
  0xe7   : > { %v720_v4 = vpop.xlane.xlu0 %719 }
  0xe8   : > { %v725_v5 = vmul.f32 0.03125, %v720_v4 }
  0xea   : > { %v727_v6 = vsub.f32 %v713_v0, %v725_v5 }
  0xeb   : > { %v723_v7 = vpop.xlane.xlu0 %722 }
  0xec   : > { %v726_v8 = vmul.f32 0.03125, %v723_v7  ;;  %v729_v9 = vmul.f32 %v727_v6, %v727_v6 }
  0xee   : > { %v728_v10 = vsub.f32 %v714_v1, %v726_v8  ;;  %v731_v11 = vsel %vm717_vm0, %v729_v9, 0.0 }
  0xef   : > { %732 = vadd.xlane.f32.xlu1 %v731_v11 }
  0xf0   : > { %v730_v12 = vmul.f32 %v728_v10, %v728_v10 }
  0xf2   : > { %v734_v13 = vsel %vm717_vm0, %v730_v12, 0.0 }
  0xf3   : > { %735 = vadd.xlane.f32.xlu1 %v734_v13 }
 0x17c   : > { %v733_v14 = vpop.xlane.xlu1 %732 }
 0x17d   : > { %v737_v15 = vmul.f32 0.03125, %v733_v14 }
 0x17f   : > { %v739_v16 = vadd.f32 1e-05, %v737_v15 }
 0x180   : > { %v736_v17 = vpop.xlane.xlu1 %735 }
 0x181   : > { %2071 = vrsqrt.f32 %v739_v16  ;;  %v738_v18 = vmul.f32 0.03125, %v736_v17 }
 0x183   : > { %v740_v19 = vadd.f32 1e-05, %v738_v18 }
 0x185   : > { %2073 = vrsqrt.f32 %v740_v19 }
 0x18b   : > { %v2072_v20 = vpop.eup %2071 }
 0x18c   : > { %v743_v22 = vmul.f32 %v2072_v20, %v727_v6 }
 0x18e   : > { %v751_v24 = vmul.f32 %v1868_v21, %v743_v22 }
 0x18f   : > { %v2074_v25 = vpop.eup %2073 }
 0x190   : > { %v759_v26 = vadd.f32 %v1869_v23, %v751_v24  ;;  %v744_v27 = vmul.f32 %v2074_v25, %v728_v10 }
 0x192   : > { %761 = vst.msk [vmem:[#allocation2] sm:$0xff] %vm717_vm0, %v759_v26  ;;  %v752_v28 = vmul.f32 %v1868_v21, %v744_v27 }
 0x194   : > { %v760_v29 = vadd.f32 %v1869_v23, %v752_v28 }
 0x196   : > { %762 = vst.msk [vmem:[#allocation2 + $0x8] sm:$0xff] %vm717_vm0, %v760_v29 }
 0x197 PF: > { %v2080_v30 = vld [vmem:[%s2415_s19] sm:$0xff]   ;;  %v2224_v31 = vmov 0.0   ;;  %v2081_v32 = vld [vmem:[%s2415_s19 + $0x8] sm:$0xff]   ;;  %vm2225_vm1 = vmmov 0   ;;  %vm789_vm2 = vcmask 261120   ;;  %s2715_s23 = scalar_lea.vmem %s2676_s5, %s2405_s28  ;;  %s2226_s24 = smov 96   ;;  %v847_v51 = vlaneseq }
 0x198   : > { %1940 = vmatprep.subr.bf16.mxu0 %v2224_v31  ;;  %1948 = vmatprep.subr.bf16.mxu1 %v2224_v31  ;;  %v1870_v36 = vld [vmem:[%s2715_s23] ss:$0 sm:$0xff]  ;;  %vm863_vm3 = vcmask 130048   ;;  %v2227_v49 = vmov 1966171168   ;;  %s2716_s21 = sld [smem:[#allocation15_spill]] }
 0x199   : > { %1941 = vmatpush3.bf16.msra.mxu0 %v2080_v30  ;;  %1944 = vmatprep.mubr.msk.bf16.mxu0 %vm2225_vm1, %v2224_v31  ;;  %v2478_v33 = vld [vmem:[#allocation2] sm:$0xff]  ;;  %v845_v50 = vunpack.c.l.s4 %v2227_v49  ;;  %v848_v53 = vshrl.u32 %v847_v51, 7  ;;  %vm973_vm4 = vcmask 64512   ;;  %s2228_s29 = smov 64   ;;  %s2229_s25 = smov 80   ;;  %vm1003_vm5 = vcmask 1043456  }
 0x19a   : > { %1942 = vmatprep.subr.bf16.mxu0 %v2224_v31  ;;  %1950 = vmatprep.mubr.msk.bf16.mxu1 %vm2225_vm1, %v2224_v31  ;;  %s2230_s18 = smov 112   ;;  %s2231_s30 = smov 48   ;;  %vm1570_vm6 = vcmask 523264  }
 0x19b   : > { %v846_v52 = vunpack.c.0.s8 %v845_v50  ;;  %v963_v58 = vsub.s32 0, %v848_v53  ;;  %s2717_s26 = sld [smem:[#allocation13_spill]]  ;;  %s2232_s19 = smov 16  }
 0x19c   : > { %p1901_p10 = scmp.ne.s32.totalorder %s2325_s22, 1 }
 0x19d   : > { %v2480_v34 = vld [vmem:[#allocation2 + $0x8] sm:$0xff]  ;;  %1943 = vmatpush3.bf16.msra.mxu0 %v2081_v32  ;;  %v849_v54 = vsub.s32 %v846_v52, %v848_v53  ;;  %vm1670_vm7 = vcmask (!%p1901_p10), 1041409   ;;  %vm1673_vm8 = vcmask (!%p1901_p10), 254976  }
 0x19e   : > { %v765_v35 = vpack.c.bf16 %v2480_v34, %v2478_v33  ;;  %1954 = vmatprep.subr.bf16.mxu0 %v2224_v31  ;;  %v1874_v55 = vld.sshfl [vmem:[%s2716_s21] sm:$0x11 pattern:$0x75316420]  ;;  %s2719_s21 = scalar_lea.vmem %s2679_s8, %s2405_s28 }
 0x19f   : > { %v843_v56 = vcombine.high %v1874_v55, %v1874_v55  ;;  %v850_v57 = vrot.slane %v1874_v55, %v849_v54 }
 0x1a0   : > { %1945 = vmatmul.mubr.msk.bf16.vlgmr.msra.gmra.mrb[0].mxu0 %vm789_vm2, %v765_v35 }
 0x1a1   : > { %1956 = vmatprep.mubr.msk.bf16.mxu0 %vm2225_vm1, %v2224_v31  ;;  %v2517_v59 = vrot.slane %v850_v57, %v963_v58  ;;  %v857_v60 = vrot.slane %v843_v56, %v849_v54 }
 0x1a3   : > { %v2520_v3 = vrot.slane %v857_v60, %v963_v58 }
 0x273   : > { %v827_v37 = vpop.f32.mrb[0].mxu0 }
 0x274   : > { %v828_v38 = vadd.f32 %v1870_v36, %v827_v37  ;;  %v1946_v39 = vpop.f32.mrb[1].mxu0 }
 0x275   : > { %v830_v40 = vpop.f32.mrb[2].mxu0 }
 0x276   : > { %v2496_v41 = vpack.c.bf16 %v828_v38, %v828_v38  ;;  %v831_v42 = vadd.f32 %v1870_v36, %v830_v40  ;;  %v1947_v43 = vpop.f32.mrb[3].mxu0 }
 0x278   : > { %861 = vrot.lane.b32.xlu0 %v2496_v41, %s2226_s24  ;;  %v2499_v44 = vpack.c.bf16 %v831_v42, %v831_v42 }
 0x27c   : > { %911 = vrot.lane.b32.xlu0 %v2499_v44, %s2226_s24  ;;  %s2718_s24 = scalar_lea.vmem %s2678_s7, %s2405_s28 }
 0x2ea   : > { %v862_v45 = vpop.permute.xlu0 %861 }
 0x2eb   : > { %v868_v46 = vsel %vm863_vm3, %v862_v45, 0 }
 0x2ec   : > { %1949 = vmatpush3.bf16.xpose.msra.mxu1 %v868_v46 }
 0x2ed   : > { %1960 = vmatprep.subr.bf16.mxu1 %v2224_v31 }
 0x2ee   : > { %v912_v47 = vpop.permute.xlu0 %911 }
 0x2ef   : > { %v917_v48 = vsel %vm863_vm3, %v912_v47, 0 }
 0x2f0   : > { %1955 = vmatpush3.bf16.xpose.msra.mxu0 %v917_v48 }
 0x2f1   : > { %1966 = vmatprep.subr.bf16.mxu0 %v2224_v31 }
 0x2f3   : > { %1951 = vmatmul.mubr.msk.bf16.vlgmr.msra.gmra.mrb[0].mxu1 %vm863_vm3, %v2496_v41 }
 0x2f4   : > { %1962 = vmatprep.mubr.msk.bf16.mxu1 %vm2225_vm1, %v2224_v31 }
 0x2f7   : > { %1957 = vmatmul.mubr.msk.bf16.vlgmr.msra.gmra.mrb[4].mxu0 %vm863_vm3, %v2499_v44 }
 0x2f8   : > { %1968 = vmatprep.mubr.msk.bf16.mxu0 %vm2225_vm1, %v2224_v31 }
 0x3c6   : > { %v904_v61 = vpop.f32.mrb[0].mxu1 }
 0x3c7   : > { %v959_v62 = vmul.f32 0.25, %v904_v61  ;;  %v1952_v63 = vpop.f32.mrb[1].mxu1 }
 0x3c8   : > { %v907_v0 = vpop.f32.mrb[2].mxu1 }
 0x3c9   : > { %v1953_v1 = vpop.f32.mrb[3].mxu1  ;;  %v971_v2 = vadd.f32 %v2517_v59, %v959_v62 }
 0x3ca   : > { %v953_v4 = vpop.f32.mrb[4].mxu0 }
 0x3cb   : > { %v960_v5 = vmul.f32 0.25, %v953_v4  ;;  %v1958_v6 = vpop.f32.mrb[5].mxu0  ;;  %v974_v7 = vsel %vm973_vm4, %v971_v2, -inf }
 0x3cc   : > { %975 = vmax.xlane.f32.xlu1 %v974_v7  ;;  %v956_v8 = vpop.f32.mrb[6].mxu0 }
 0x3cd   : > { %v1959_v9 = vpop.f32.mrb[7].mxu0  ;;  %v972_v10 = vadd.f32 %v2520_v3, %v960_v5 }
 0x3cf   : > { %v977_v11 = vsel %vm973_vm4, %v972_v10, -inf }
 0x3d0   : > { %978 = vmax.xlane.f32.xlu1 %v977_v11 }
 0x3e1   : > { %998 = vrot.lane.b32.xlu1 %v2496_v41, %s2228_s29 }
 0x3e5   : > { %1047 = vrot.lane.b32.xlu1 %v2499_v44, %s2228_s29 }
 0x3e9   : > { %1097 = vrot.lane.b32.xlu1 %v2496_v41, %s2229_s25 }
 0x459   : > { %v976_v12 = vpop.xlane.xlu1 %975 }
 0x45a   : > { %v980_v13 = vsub.f32 %v971_v2, %v976_v12 }
 0x45c   : > { %v982_v14 = vmul.f32 1.442695, %v980_v13 }
 0x45d   : > { %v979_v15 = vpop.xlane.xlu1 %978 }
 0x45e   : > { %2090 = vpow2.f32 %v982_v14  ;;  %v981_v16 = vsub.f32 %v972_v10, %v979_v15 }
 0x460   : > { %v984_v17 = vmul.f32 1.442695, %v981_v16 }
 0x461   : > { %v999_v18 = vpop.permute.xlu1 %998 }
 0x462   : > { %2092 = vpow2.f32 %v984_v17  ;;  %v1005_v19 = vsel %vm1003_vm5, %v999_v18, 0 }
 0x463   : > { %1961 = vmatpush3.bf16.msra.mxu1 %v1005_v19 }
 0x464   : > { %1972 = vmatprep.subr.bf16.mxu1 %v2224_v31 }
 0x465   : > { %v1048_v20 = vpop.permute.xlu1 %1047 }
 0x466   : > { %v1053_v21 = vsel %vm1003_vm5, %v1048_v20, 0 }
 0x467   : > { %1967 = vmatpush3.bf16.msra.mxu0 %v1053_v21 }
 0x468   : > { %v2091_v22 = vpop.eup %2090  ;;  %1978 = vmatprep.subr.bf16.mxu0 %v2224_v31 }
 0x469   : > { %v986_v23 = vsel %vm973_vm4, %v2091_v22, 0.0  ;;  %v1098_v26 = vpop.permute.xlu1 %1097 }
 0x46a   : > { %987 = vadd.xlane.f32.xlu0 %v986_v23  ;;  %v1103_v36 = vsel %vm863_vm3, %v1098_v26, 0  ;;  %v2082_v23 = vld [vmem:[%s2717_s26] sm:$0xff]  }
 0x46c   : > { %v2093_v24 = vpop.eup %2092 }
 0x46d   : > { %v989_v25 = vsel %vm973_vm4, %v2093_v24, 0.0 }
 0x46e   : > { %990 = vadd.xlane.f32.xlu1 %v989_v25 }
 0x47f   : > { %1147 = vrot.lane.b32.xlu1 %v2499_v44, %s2229_s25  ;;  %s2720_s25 = scalar_lea.vmem %s2680_s9, %s2405_s28 }
 0x480   : > { %1095 = vrot.lane.b32.xlu0 %v2496_v41, %s2230_s18 }
 0x483   : > { %1145 = vrot.lane.b32.xlu1 %v2499_v44, %s2230_s18 }
 0x4f7   : > { %v988_v27 = vpop.xlane.xlu0 %987 }
 0x4f8   : > { %2094 = vrcp.f32 %v988_v27 }
 0x4fb   : > { %v991_v28 = vpop.xlane.xlu1 %990  ;;  %v1096_v42 = vpop.permute.xlu0 %1095 }
 0x4fc   : > { %2096 = vrcp.f32 %v991_v28 }
 0x4ff   : > { %v1148_v38 = vpop.permute.xlu1 %1147 }
 0x500   : > { %v1153_v40 = vsel %vm863_vm3, %v1148_v38, 0 }
 0x502   : > { %v2095_v29 = vpop.eup %2094 }
 0x503   : > { %v994_v30 = vmul.f32 %v2095_v29, %v2091_v22  ;;  %v1146_v43 = vpop.permute.xlu1 %1145 }
 0x505   : > { %v996_v32 = vpack.c.bf16 %v994_v30, %v994_v30 }
 0x506   : > { %v2097_v35 = vpop.eup %2096 }
 0x507   : > { %v995_v37 = vmul.f32 %v2097_v35, %v2093_v24  ;;  %1963 = vmatmul.mubr.msk.bf16.vlgmr.msra.gmra.mrb[4].mxu1 %vm973_vm4, %v996_v32  ;;  %v2083_v24 = vld [vmem:[%s2717_s26 + $0x8] sm:$0xff]  }
 0x508   : > { %1973 = vmatpush3.bf16.xpose.msra.mxu1 %v1103_v36  ;;  %1974 = vmatprep.mubr.msk.bf16.mxu1 %vm2225_vm1, %v2224_v31 }
 0x509   : > { %v997_v39 = vpack.c.bf16 %v995_v37, %v995_v37  ;;  %1984 = vmatprep.subr.bf16.mxu1 %v2224_v31 }
 0x50b   : > { %1969 = vmatmul.mubr.msk.bf16.vlgmr.msra.gmra.mrb[8].mxu0 %vm973_vm4, %v997_v39 }
 0x50c   : > { %1979 = vmatpush3.bf16.xpose.msra.mxu0 %v1153_v40  ;;  %1980 = vmatprep.mubr.msk.bf16.mxu0 %vm2225_vm1, %v2224_v31 }
 0x50d   : > { %1990 = vmatprep.subr.bf16.mxu0 %v2224_v31 }
 0x50f   : > { %1975 = vmatmul.mubr.msk.bf16.vlgmr.msra.gmra.mrb[8].mxu1 %vm863_vm3, %v1096_v42 }
 0x510   : > { %1986 = vmatprep.mubr.msk.bf16.mxu1 %vm2225_vm1, %v2224_v31 }
 0x513   : > { %1981 = vmatmul.mubr.msk.bf16.vlgmr.msra.gmra.mrb[12].mxu0 %vm863_vm3, %v1146_v43 }
 0x514   : > { %1992 = vmatprep.mubr.msk.bf16.mxu0 %vm2225_vm1, %v2224_v31 }
 0x5da   : > { %v2553_v45 = vpop.f32.mrb[4].mxu1 }
 0x5db   : > { %v1964_v46 = vpop.f32.mrb[5].mxu1 }
 0x5dc   : > { %v1044_v47 = vpop.f32.mrb[6].mxu1  ;;  %v1883_v46 = vld [vmem:[%s2718_s24] ss:$0 sm:$0xff] }
 0x5dd   : > { %v1965_v48 = vpop.f32.mrb[7].mxu1 }
 0x5de   : > { %v2555_v49 = vpop.f32.mrb[8].mxu0 }
 0x5df   : > { %v1970_v50 = vpop.f32.mrb[9].mxu0 }
 0x5e0   : > { %v1092_v51 = vpop.f32.mrb[10].mxu0 }
 0x5e1   : > { %v1971_v52 = vpop.f32.mrb[11].mxu0 }
 0x5e2   : > { %v1139_v53 = vpop.f32.mrb[8].mxu1 }
 0x5e3   : > { %v1195_v54 = vmul.f32 0.25, %v1139_v53  ;;  %v1976_v55 = vpop.f32.mrb[9].mxu1 }
 0x5e4   : > { %v1142_v56 = vpop.f32.mrb[10].mxu1 }
 0x5e5   : > { %v1977_v57 = vpop.f32.mrb[11].mxu1  ;;  %v1197_v58 = vadd.f32 %v1195_v54, %v2517_v59 }
 0x5e6   : > { %v1189_v60 = vpop.f32.mrb[12].mxu0 }
 0x5e7   : > { %v1196_v61 = vmul.f32 0.25, %v1189_v60  ;;  %v1982_v62 = vpop.f32.mrb[13].mxu0  ;;  %v1199_v63 = vsel %vm973_vm4, %v1197_v58, -inf }
 0x5e8   : > { %1200 = vmax.xlane.f32.xlu1 %v1199_v63  ;;  %v1192_v0 = vpop.f32.mrb[14].mxu0 }
 0x5e9   : > { %v1983_v1 = vpop.f32.mrb[15].mxu0  ;;  %v1198_v2 = vadd.f32 %v1196_v61, %v2520_v3 }
 0x5eb   : > { %v1202_v4 = vsel %vm973_vm4, %v1198_v2, -inf }
 0x5ec   : > { %1203 = vmax.xlane.f32.xlu0 %v1202_v4 }
 0x602   : > { %1271 = vrot.lane.b32.xlu0 %v2499_v44, %s2231_s30 }
 0x675   : > { %v1201_v5 = vpop.xlane.xlu1 %1200 }
 0x676   : > { %v1205_v6 = vsub.f32 %v1197_v58, %v1201_v5 }
 0x678   : > { %v1207_v7 = vmul.f32 1.442695, %v1205_v6 }
 0x679   : > { %v1204_v59 = vpop.xlane.xlu0 %1203 }
 0x67a   : > { %2098 = vpow2.f32 %v1207_v7  ;;  %v1206_v8 = vsub.f32 %v1198_v2, %v1204_v59  ;;  %v2085_v2 = vld [vmem:[%s2437_s4 + $0x8] sm:$0xff]  }
 0x67c   : > { %v1209_v9 = vmul.f32 1.442695, %v1206_v8 }
 0x67d   : > { %v1272_v10 = vpop.permute.xlu0 %1271 }
 0x67e   : > { %2100 = vpow2.f32 %v1209_v9  ;;  %v1277_v11 = vsel %vm1003_vm5, %v1272_v10, 0  ;;  %v1887_v10 = vld [vmem:[%s2719_s21] ss:$0 sm:$0xff] }
 0x67f   : > { %1991 = vmatpush3.bf16.msra.mxu0 %v1277_v11 }
 0x680   : > { %2004 = vmatprep.subr.bf16.mxu0 %v2224_v31 }
 0x684   : > { %v2099_v3 = vpop.eup %2098 }
 0x685   : > { %v1211_v12 = vsel %vm973_vm4, %v2099_v3, 0.0 }
 0x686   : > { %1212 = vadd.xlane.f32.xlu1 %v1211_v12 }
 0x688   : > { %v2101_v13 = vpop.eup %2100 }
 0x689   : > { %v1214_v44 = vsel %vm973_vm4, %v2101_v13, 0.0 }
 0x68a   : > { %1215 = vadd.xlane.f32.xlu1 %v1214_v44  ;;  %v1888_v44 = vld [vmem:[%s2720_s25] ss:$0 sm:$0xff] }
 0x69b   : > { %1223 = vrot.lane.b32.xlu1 %v2496_v41, %s2231_s30 }
 0x713   : > { %v1213_v14 = vpop.xlane.xlu1 %1212 }
 0x714   : > { %2102 = vrcp.f32 %v1213_v14 }
 0x717   : > { %v1216_v15 = vpop.xlane.xlu1 %1215 }
 0x718   : > { %2104 = vrcp.f32 %v1216_v15 }
 0x71b   : > { %v1224_v16 = vpop.permute.xlu1 %1223 }
 0x71c   : > { %v1229_v17 = vsel %vm1003_vm5, %v1224_v16, 0 }
 0x71d   : > { %1985 = vmatpush3.bf16.msra.mxu1 %v1229_v17 }
 0x71e   : > { %v2103_v18 = vpop.eup %2102  ;;  %1996 = vmatprep.subr.bf16.mxu1 %v2224_v31 }
 0x71f   : > { %v1219_v19 = vmul.f32 %v2103_v18, %v2099_v3  ;;  %v2086_v18 = vld [vmem:[%s2447_s1] sm:$0xff]  }
 0x721   : > { %v1221_v20 = vpack.c.bf16 %v1219_v19, %v1219_v19  ;;  %v2087_v19 = vld [vmem:[%s2447_s1 + $0x8] sm:$0xff]  }
 0x722   : > { %v2105_v21 = vpop.eup %2104 }
 0x723   : > { %v1220_v22 = vmul.f32 %v2105_v21, %v2101_v13  ;;  %1987 = vmatmul.mubr.msk.bf16.vlgmr.msra.gmra.mrb[12].mxu1 %vm973_vm4, %v1221_v20  ;;  %v2088_v20 = vld [vmem:[%s2447_s1 + $0x10] sm:$0xff]   ;;  %v2089_v21 = vld [vmem:[%s2447_s1 + $0x18] sm:$0xff]  }
 0x724   : > { %2000 = vmatprep.mubr.msk.bf16.mxu1 %vm2225_vm1, %v2224_v31  ;;  %1997 = vmatpush3.bf16.msra.mxu1 %v2082_v23 }
 0x725   : > { %v1222_v41 = vpack.c.bf16 %v1220_v22, %v1220_v22  ;;  %1998 = vmatprep.subr.bf16.mxu1 %v2224_v31  ;;  %v1889_v22 = vld [vmem:[%s693_s6] ss:$0 sm:$0xff] }
 0x727   : > { %1993 = vmatmul.mubr.msk.bf16.vlgmr.msra.gmra.mrb[16].mxu0 %vm973_vm4, %v1222_v41 }
 0x728   : > { %2008 = vmatprep.mubr.msk.bf16.mxu0 %vm2225_vm1, %v2224_v31  ;;  %1999 = vmatpush3.bf16.msra.mxu1 %v2083_v24 }
 0x729   : > { %2012 = vmatprep.subr.bf16.mxu1 %v2224_v31 }
 0x7f6   : > { %v1265_v25 = vpop.f32.mrb[12].mxu1 }
 0x7f7   : > { %v1988_v26 = vpop.f32.mrb[13].mxu1 }
 0x7f8   : > { %v1268_v27 = vpop.f32.mrb[14].mxu1 }
 0x7f9   : > { %v1989_v28 = vpop.f32.mrb[15].mxu1 }
 0x7fa   : > { %v1313_v29 = vpop.f32.mrb[16].mxu0 }
 0x7fb   : > { %v2075_v30 = vpack.i.bf16 %v1313_v29, %v1265_v25  ;;  %v1994_v32 = vpop.f32.mrb[17].mxu0 }
 0x7fc   : > { %v1316_v35 = vpop.f32.mrb[18].mxu0 }
 0x7fd   : > { %2076 = vrot.lane.b32.xlu1 %v2075_v30, %s2232_s19  ;;  %v1995_v36 = vpop.f32.mrb[19].mxu0 }
 0x86f   : > { %v2077_v37 = vpop.permute.xlu1 %2076 }
 0x870   : > { %v2079_v38 = vunpack.i.h.bf16 %v2077_v37  ;;  %v2078_v39 = vunpack.i.l.bf16 %v2077_v37 }
 0x872   : > { %v1328_v40 = vsel %vm863_vm3, %v2555_v49, %v2079_v38  ;;  %v1327_v42 = vsel %vm863_vm3, %v2553_v45, %v2078_v39 }
 0x873   : > { %v1329_v43 = vpack.c.bf16 %v1328_v40, %v1327_v42 }
 0x875   : > { %2001 = vmatmul.mubr.msk.bf16.vlgmr.msra.gmra.mrb[16].mxu1 %vm789_vm2, %v1329_v43 }
 0x876   : > { %2020 = vmatprep.mubr.msk.bf16.mxu1 %vm2225_vm1, %v2224_v31  ;;  %2013 = vmatpush3.bf16.msra.mxu1 %v2086_v18 }
 0x877   : > { %2014 = vmatprep.subr.bf16.mxu1 %v2224_v31 }
 0x87a   : > { %2015 = vmatpush3.bf16.msra.mxu1 %v2087_v19 }
 0x87b   : > { %2016 = vmatprep.subr.bf16.mxu1 %v2224_v31 }
 0x87e   : > { %2017 = vmatpush3.bf16.msra.mxu1 %v2088_v20 }
 0x87f   : > { %2018 = vmatprep.subr.bf16.mxu1 %v2224_v31 }
 0x882   : > { %2019 = vmatpush3.bf16.msra.mxu1 %v2089_v21 }
 0x948   : > { %v1390_v47 = vpop.f32.mrb[16].mxu1 }
 0x949   : > { %v1391_v48 = vadd.f32 %v1883_v46, %v1390_v47  ;;  %v2002_v50 = vpop.f32.mrb[17].mxu1 }
 0x94a   : > { %v1393_v51 = vpop.f32.mrb[18].mxu1 }
 0x94b   : > { %v1394_v52 = vadd.f32 %v1883_v46, %v1393_v51  ;;  %v2003_v49 = vpop.f32.mrb[19].mxu1  ;;  %v1397_v53 = vadd.f32 %v1391_v48, %v2478_v33 }
 0x94c   : > { %v1893_v49 = vld [vmem:[%s701_s27] ss:$0 sm:$0xff] }
 0x94d   : > { %v1401_v45 = vsel %vm789_vm2, %v1397_v53, 0.0  ;;  %v1398_v54 = vadd.f32 %v1394_v52, %v2480_v34  ;;  %v2084_v34 = vld [vmem:[%s2437_s4] sm:$0xff]  }
 0x94e   : > { %1402 = vadd.xlane.f32.xlu1 %v1401_v45  ;;  %2005 = vmatpush3.bf16.msra.mxu0 %v2084_v34 }
 0x94f   : > { %v1404_v55 = vsel %vm789_vm2, %v1398_v54, 0.0  ;;  %2006 = vmatprep.subr.bf16.mxu0 %v2224_v31 }
 0x950   : > { %1405 = vadd.xlane.f32.xlu0 %v1404_v55 }
 0x952   : > { %2007 = vmatpush3.bf16.msra.mxu0 %v2085_v2 }
 0x9db   : > { %v1403_v56 = vpop.xlane.xlu1 %1402 }
 0x9dc   : > { %v1408_v57 = vmul.f32 0.03125, %v1403_v56 }
 0x9dd   : > { %v1406_v58 = vpop.xlane.xlu0 %1405 }
 0x9de   : > { %v1410_v60 = vsub.f32 %v1397_v53, %v1408_v57  ;;  %v1409_v61 = vmul.f32 0.03125, %v1406_v58 }
 0x9e0   : > { %v1411_v62 = vsub.f32 %v1398_v54, %v1409_v61  ;;  %v1412_v63 = vmul.f32 %v1410_v60, %v1410_v60 }
 0x9e2   : > { %v1414_v0 = vsel %vm789_vm2, %v1412_v63, 0.0  ;;  %v1413_v33 = vmul.f32 %v1411_v62, %v1411_v62 }
 0x9e3   : > { %1415 = vadd.xlane.f32.xlu0 %v1414_v0 }
 0x9e4   : > { %v1417_v1 = vsel %vm789_vm2, %v1413_v33, 0.0 }
 0x9e5   : > { %1418 = vadd.xlane.f32.xlu1 %v1417_v1 }
 0xa70   : > { %v1416_v4 = vpop.xlane.xlu0 %1415 }
 0xa71   : > { %v1420_v5 = vmul.f32 0.03125, %v1416_v4 }
 0xa72   : > { %v1419_v6 = vpop.xlane.xlu1 %1418 }
 0xa73   : > { %v1422_v7 = vadd.f32 1e-05, %v1420_v5  ;;  %v1421_v59 = vmul.f32 0.03125, %v1419_v6 }
 0xa75   : > { %2106 = vrsqrt.f32 %v1422_v7  ;;  %v1423_v8 = vadd.f32 1e-05, %v1421_v59 }
 0xa77   : > { %2108 = vrsqrt.f32 %v1423_v8 }
 0xa7f   : > { %v2107_v9 = vpop.eup %2106 }
 0xa80   : > { %v1426_v11 = vmul.f32 %v2107_v9, %v1410_v60 }
 0xa81   : > { %v2109_v3 = vpop.eup %2108 }
 0xa82   : > { %v1434_v12 = vmul.f32 %v1887_v10, %v1426_v11  ;;  %v1427_v13 = vmul.f32 %v2109_v3, %v1411_v62 }
 0xa84   : > { %v1435_v14 = vmul.f32 %v1887_v10, %v1427_v13  ;;  %v1442_v15 = vadd.f32 %v1888_v44, %v1434_v12  ;;  %v1899_v13 = vld [vmem:[%s704_s17] ss:$0 sm:$0xff] }
 0xa86   : > { %v1443_v16 = vadd.f32 %v1888_v44, %v1435_v14 }
 0xa88   : > { %v1444_v17 = vpack.c.bf16 %v1443_v16, %v1442_v15 }
 0xa8a   : > { %2009 = vmatmul.mubr.msk.bf16.vlgmr.msra.gmra.mrb[20].mxu0 %vm789_vm2, %v1444_v17 }
 0xb5d   : > { %v1505_v41 = vpop.f32.mrb[20].mxu0 }
 0xb5e   : > { %v1506_v23 = vadd.f32 %v1889_v22, %v1505_v41  ;;  %v2010_v24 = vpop.f32.mrb[21].mxu0 }
 0xb5f   : > { %v1508_v25 = vpop.f32.mrb[22].mxu0 }
 0xb60   : > { %v1512_v26 = vmul.f32 %v1506_v23, %v1506_v23  ;;  %v1509_v27 = vadd.f32 %v1889_v22, %v1508_v25  ;;  %v2011_v28 = vpop.f32.mrb[23].mxu0 }
 0xb62   : > { %v1514_v29 = vmul.f32 %v1512_v26, %v1506_v23  ;;  %v1513_v30 = vmul.f32 %v1509_v27, %v1509_v27 }
 0xb64   : > { %v1516_v32 = vmul.f32 0.044715, %v1514_v29  ;;  %v1515_v35 = vmul.f32 %v1513_v30, %v1509_v27 }
 0xb66   : > { %v1518_v36 = vadd.f32 %v1516_v32, %v1506_v23  ;;  %v1517_v31 = vmul.f32 0.044715, %v1515_v35 }
 0xb68   : > { %v1520_v37 = vmul.f32 0.7978846, %v1518_v36  ;;  %v1519_v38 = vadd.f32 %v1517_v31, %v1509_v27 }
 0xb6a   : > { %2110 = vtanh.f32 %v1520_v37  ;;  %v1521_v39 = vmul.f32 0.7978846, %v1519_v38 }
 0xb6c   : > { %2112 = vtanh.f32 %v1521_v39 }
 0xb74   : > { %v2111_v40 = vpop.eup %2110 }
 0xb75   : > { %v1524_v42 = vadd.f32 1.0, %v2111_v40 }
 0xb76   : > { %v2113_v43 = vpop.eup %2112 }
 0xb77   : > { %v1526_v46 = vmul.f32 0.5, %v1524_v42  ;;  %v1525_v47 = vadd.f32 1.0, %v2113_v43 }
 0xb79   : > { %v1527_v48 = vmul.f32 0.5, %v1525_v47  ;;  %v1528_v50 = vmul.f32 %v1526_v46, %v1506_v23 }
 0xb7b   : > { %v1529_v51 = vmul.f32 %v1527_v48, %v1509_v27 }
 0xb7d   : > { %v1530_v52 = vpack.c.bf16 %v1529_v51, %v1528_v50 }
 0xb7f   : > { %2021 = vmatmul.mubr.msk.bf16.vlgmr.msra.gmra.mrb[20].mxu1 %vm1570_vm6, %v1530_v52 }
 0xc52   : > { %v1608_v53 = vpop.f32.mrb[20].mxu1 }
 0xc53   : > { %v1609_v45 = vadd.f32 %v1893_v49, %v1608_v53  ;;  %v2022_v54 = vpop.f32.mrb[21].mxu1 }
 0xc54   : > { %v1611_v55 = vpop.f32.mrb[22].mxu1 }
 0xc55   : > { %v1612_v56 = vadd.f32 %v1893_v49, %v1611_v55  ;;  %v2023_v57 = vpop.f32.mrb[23].mxu1  ;;  %v1615_v58 = vadd.f32 %v1609_v45, %v1442_v15  ;;  %v1900_v15 = vld [vmem:[%s707_s3] ss:$0 sm:$0xff] }
 0xc57   : > { %v1619_v60 = vsel %vm789_vm2, %v1615_v58, 0.0  ;;  %v1616_v61 = vadd.f32 %v1612_v56, %v1443_v16 }
 0xc58   : > { %1620 = vadd.xlane.f32.xlu0 %v1619_v60 }
 0xc59   : > { %v1622_v62 = vsel %vm789_vm2, %v1616_v61, 0.0 }
 0xc5a   : > { %1623 = vadd.xlane.f32.xlu1 %v1622_v62 }
 0xce5   : > { %v1621_v63 = vpop.xlane.xlu0 %1620 }
 0xce6   : > { %v1625_v0 = vmul.f32 0.03125, %v1621_v63 }
 0xce7   : > { %v1624_v33 = vpop.xlane.xlu1 %1623 }
 0xce8   : > { %v1627_v1 = vsub.f32 %v1615_v58, %v1625_v0  ;;  %v1626_v34 = vmul.f32 0.03125, %v1624_v33 }
 0xcea   : > { %v1628_v2 = vsub.f32 %v1616_v61, %v1626_v34  ;;  %v1629_v4 = vmul.f32 %v1627_v1, %v1627_v1 }
 0xcec   : > { %v1631_v5 = vsel %vm789_vm2, %v1629_v4, 0.0  ;;  %v1630_v6 = vmul.f32 %v1628_v2, %v1628_v2 }
 0xced   : > { %1632 = vadd.xlane.f32.xlu0 %v1631_v5 }
 0xcee   : > { %v1634_v7 = vsel %vm789_vm2, %v1630_v6, 0.0 }
 0xcef   : > { %1635 = vadd.xlane.f32.xlu1 %v1634_v7 }
 0xd7a   : > { %v1633_v59 = vpop.xlane.xlu0 %1632 }
 0xd7b   : > { %v1637_v8 = vmul.f32 0.03125, %v1633_v59 }
 0xd7c   : > { %v1636_v9 = vpop.xlane.xlu1 %1635 }
 0xd7d   : > { %v1639_v10 = vadd.f32 1e-05, %v1637_v8  ;;  %v1638_v11 = vmul.f32 0.03125, %v1636_v9 }
 0xd7f   : > { %2114 = vrsqrt.f32 %v1639_v10  ;;  %v1640_v3 = vadd.f32 1e-05, %v1638_v11 }
 0xd81   : > { %2116 = vrsqrt.f32 %v1640_v3 }
 0xd89   : > { %v2115_v12 = vpop.eup %2114 }
 0xd8a   : > { %v1643_v44 = vmul.f32 %v2115_v12, %v1627_v1 }
 0xd8b   : > { %v2117_v14 = vpop.eup %2116 }
 0xd8c   : > { %v1651_v16 = vmul.f32 %v1899_v13, %v1643_v44  ;;  %v1644_v17 = vmul.f32 %v2117_v14, %v1628_v2  ;;  %1666 = sbr.rel (%p1901_p10) target bundleno = 3478 (0xd96), region = 100 }
 0xd8e   : > { %v1659_v18 = vadd.f32 %v1900_v15, %v1651_v16  ;;  %v1652_v19 = vmul.f32 %v1899_v13, %v1644_v17 }
 0xd90   : > { %1661 = vst.msk [vmem:[#allocation2] sm:$0xff] %vm789_vm2, %v1659_v18  ;;  %v1660_v20 = vadd.f32 %v1900_v15, %v1652_v19 }
 0xd92   : > { %1662 = vst.msk [vmem:[#allocation2 + $0x8] sm:$0xff] %vm789_vm2, %v1660_v20  ;;  %v1669_v21 = vrot.slane (!%p1901_p10), %v1660_v20, 7 }
 0xd94   : > { %v1671_v22 = vsel %vm1670_vm7, %v1669_v21, %v1659_v18 }
 0xd95   : > { %1674 = vst.msk [vmem:[#allocation8] sm:$0x3] %vm1673_vm8, %v1671_v22 }
 0xd96 PF: > { %p2047_p11 = scmp.eq.s32.totalorder %s2325_s22, 1  ;;  %s2233_s3 = smov [#allocation8]  }
 0xd97   : > { %s1682_s28 = sshll.u32 %s2233_s3, 4  ;;  %s1683_s28 = int_to_ptr.vmem [resolvable:$true] %s1682_s28 }
 0xd98   : > { %s2174_s17 = scalar_lea.vmem %s1683_s28, 32  ;;  %p2181_p1 = scmp.lt.s32.totalorder %s1683_s28, %s1683_s28 }
 0xd99   : > { %p2175_p12 = scmp.ne.s32.totalorder %s1683_s28, %s2174_s17  ;;  %p2182_p5 = scmp.lt.s32.totalorder %s2174_s17, %s2174_s17 }
 0xd9b   : > { %p2176_p13 = pnand %p2175_p12, %p2047_p11  ;;  %p2183_p7 = por %p2182_p5, %p2181_p1 }
 0xd9d   : > { %p2177_p0 = pneg %p2176_p13 }
 0xd9f   : > { %p2184_p8 = pnand %p2183_p7, %p2177_p0 }
 0xda1   : > { %2187 = shalt.err (!%p2184_p8)
}
 0xda2   : > { %s2721_s16 = sld [smem:[#allocation19_spill]] }
 0xda8   : > { %s2188_s0 = scalar_lea.hbm %s2721_s16, 32 }
 0xda9   : > { %p2189_p2 = scmp.ne.s32.totalorder %s2721_s16, %s2188_s0  ;;  %p2194_p9 = scmp.lt.u32.totalorder %s2188_s0, %s2721_s16 }
 0xdab   : > { %p2190_p3 = pnand %p2189_p2, %p2047_p11 }
 0xdad   : > { %p2191_p4 = pneg %p2190_p3 }
 0xdaf   : > { %p2196_p6 = pnand %p2194_p9, %p2191_p4 }
 0xdb1   : > { %2199 = shalt.err (!%p2196_p6)
}
 0xdb2   : > { %2033 = dma.vmem_to_hbm [thread:$0]  (%p2047_p11), %s1683_s28, 32, %s2721_s16, [#allocation5]  }
 0xdb3   : > { %2213 = dma.done.wait (%p2047_p11), [#allocation5], 32  }
 0xdb4   : > { %2215 = vsyncadd (%p2047_p11), [#allocation5], 4294967264 }
 0xdb5 PF: > { %s2722_s6 = sld [smem:[#allocation12_spill]] }
 0xdbb   : > { %s29_s21 = sadd.s32 1, %s2722_s6  }
 0xdbc   : > { %p26_p10 = scmp.ge.s32.totalorder %s29_s21, 4  }
 0xdbe   :  { %28 = sbr.rel (!%p26_p10) target bundleno = 10 (0xa), region = 161 }
 0xdc5   :  { %1695 = vsyncpa [#allocation4], 1 }
 0xdc6   :  { %1697 = vsyncpa [#allocation4 + $0x1], 1 }
 0xdc7   :  { %1698 = vsyncpa [#allocation7], 1 }
 0xdc8   :  { %1699 = vsyncpa [#allocation5], 1 }
 0xdc9   :  { %1701 = vsyncpa [#allocation5 + $0x1], 1 }

</bundles_post_ra>
